<compile_context>
chip_gen: v6e
topology: v6e:2x2x1
jax: 0.10.0
libtpu: 0.0.40
codegen_flags: <defaults>
</compile_context>

<pallas_src>
import jax
import jax.numpy as jnp
from jax import lax
from jax.experimental import pallas as pl
from jax.experimental.pallas import tpu as pltpu


# ----------------------------------------------------------------------------
# Kernel 1: serial LSTM recurrence over time. The input projection (incl. bias)
# is already folded into x_proj. Gate columns are pre-permuted to (i, f, o, g).
#
# NOTE: the (h, c) carry lives in per-core scratch and is (re)initialized only
# at t_idx == 0, so the time axis (grid axis 1) MUST remain the innermost grid
# axis and MUST stay "arbitrary" (sequential). Do not reorder the grid axes.
# ----------------------------------------------------------------------------
def _lstm_recurrence_kernel(xproj_ref, whh_ref, h0_ref, c0_ref,
                            hn_ref, cn_ref,
                            h_scr, c_scr):
    t_idx = pl.program_id(1)

    @pl.when(t_idx == 0)
    def _():
        h_scr[...] = h0_ref[...]
        c_scr[...] = c0_ref[...]

    TT = xproj_ref.shape[0]
    H = h_scr.shape[1]

    # Load W_hh once per grid step; the unrolled fori_loop lets Mosaic hoist the
    # MXU weight push across the TT timesteps.
    whh = whh_ref[...]                                   # (H, 4H) f32

    def body(tt, carry):
        h, c = carry
        gates = xproj_ref[tt] + jnp.dot(h, whh, preferred_element_type=jnp.float32)
        # Gate order (i, f, o, g): one contiguous sigmoid slab + one tanh slab.
        sig = jax.nn.sigmoid(gates[:, :3 * H])
        i_g = sig[:, 0 * H:1 * H]
        f_g = sig[:, 1 * H:2 * H]
        o_g = sig[:, 2 * H:3 * H]
        g_g = jnp.tanh(gates[:, 3 * H:4 * H])
        c = f_g * c + i_g * g_g
        h = o_g * jnp.tanh(c)
        return (h, c)

    h, c = lax.fori_loop(0, TT, body, (h_scr[...], c_scr[...]), unroll=True)

    h_scr[...] = h
    c_scr[...] = c

    @pl.when(t_idx == pl.num_programs(1) - 1)
    def _():
        hn_ref[...] = h
        cn_ref[...] = c


# ----------------------------------------------------------------------------
# Kernel 2: final vocab projection, tiled along batch AND vocab (keeps W_out
# out of VMEM during the recurrence and bounds f32 output double-buffers).
# ----------------------------------------------------------------------------
def _out_proj_kernel(h_ref, w_ref, b_ref, o_ref):
    o_ref[...] = (jnp.dot(h_ref[...], w_ref[...],
                          preferred_element_type=jnp.float32)
                  + b_ref[...])


def _pick_divisor(n, candidates):
    for c in candidates:
        if c <= n and n % c == 0:
            return c
    return n


def simple_lstm_forward(x_ids, params, hidden=None, *, tt_max=8):
    """x_ids: int32 (B, T) token ids. Returns (logits (B, V), (h_n (1,B,H), c_n (1,B,H)))."""
    emb_w = params["embedding"]            # (V, E)
    W_ih = params["W_ih"]                  # (E, 4H)   gate order (i, f, g, o)  (PyTorch)
    W_hh = params["W_hh"]                  # (H, 4H)
    b = params["b"]                        # (1, 4H)   (b_ih + b_hh)
    W_out = params["W_out"]                # (H, V)
    b_out = params["b_out"]                # (1, V)

    B, T = x_ids.shape
    H = W_hh.shape[0]
    V = W_out.shape[1]

    # --- permute gate columns (i, f, g, o) -> (i, f, o, g) at trace time ---
    gate_perm = jnp.concatenate([
        jnp.arange(0 * H, 1 * H),   # i
        jnp.arange(1 * H, 2 * H),   # f
        jnp.arange(3 * H, 4 * H),   # o
        jnp.arange(2 * H, 3 * H),   # g
    ])
    W_ih_p = jnp.take(W_ih, gate_perm, axis=1).astype(jnp.float32)
    W_hh_p = jnp.take(W_hh, gate_perm, axis=1).astype(jnp.float32)
    b_p = jnp.take(b, gate_perm, axis=1).astype(jnp.float32)

    # --- pad batch to a sublane multiple (f32 -> 8) ---
    B_pad = max(8, ((B + 7) // 8) * 8)
    if B_pad != B:
        x_ids = jnp.pad(x_ids, ((0, B_pad - B), (0, 0)))

    if hidden is None:
        h0 = jnp.zeros((B_pad, H), jnp.float32)
        c0 = jnp.zeros((B_pad, H), jnp.float32)
    else:
        h0 = hidden[0][0].astype(jnp.float32)
        c0 = hidden[1][0].astype(jnp.float32)
        if B_pad != B:
            h0 = jnp.pad(h0, ((0, B_pad - B), (0, 0)))
            c0 = jnp.pad(c0, ((0, B_pad - B), (0, 0)))

    # --- hoisted input projection: one large GEMM over all timesteps, bias folded
    #     in; embedding gather + time-major transpose fuse into it under XLA ---
    x_emb = jnp.take(emb_w.astype(jnp.float32), x_ids, axis=0)            # (B, T, E)
    x_proj = (jnp.einsum("bte,eg->tbg", x_emb, W_ih_p,
                         preferred_element_type=jnp.float32)
              + b_p)                                                       # (T, B, 4H) f32

    # --- tiling ---
    TT = _pick_divisor(T, (tt_max, 8, 4, 2, 1))                 # timesteps per grid step
    # 256-row batch tiles fill the v6e/v7x 256x256 MXU at large batch;
    # v5e (128x128 MXU) still picks <=128 for typical batches.
    BB = _pick_divisor(B_pad, (256, 128, 64, 32, 16, 8))        # batch tile
    nt = T // TT
    nb = B_pad // BB

    cost = pl.CostEstimate(
        flops=2 * B_pad * T * H * 4 * H,          # h @ W_hh over all steps
        transcendentals=5 * B_pad * T * H,        # 3 sigmoid + 2 tanh per element/step
        bytes_accessed=T * B_pad * 4 * H * 4 + H * 4 * H * 4 + 4 * B_pad * H * 4,
    )

    h_n, c_n = pl.pallas_call(
        _lstm_recurrence_kernel,
        out_shape=(
            jax.ShapeDtypeStruct((B_pad, H), jnp.float32),   # h_n
            jax.ShapeDtypeStruct((B_pad, H), jnp.float32),   # c_n
        ),
        grid_spec=pltpu.PrefetchScalarGridSpec(
            num_scalar_prefetch=0,
            grid=(nb, nt),                                    # time axis MUST stay innermost
            in_specs=[
                pl.BlockSpec((TT, BB, 4 * H), lambda bi, ti: (ti, bi, 0)),  # x_proj
                pl.BlockSpec((H, 4 * H), lambda bi, ti: (0, 0)),            # W_hh
                pl.BlockSpec((BB, H), lambda bi, ti: (bi, 0)),              # h0
                pl.BlockSpec((BB, H), lambda bi, ti: (bi, 0)),              # c0
            ],
            out_specs=[
                pl.BlockSpec((BB, H), lambda bi, ti: (bi, 0)),              # h_n
                pl.BlockSpec((BB, H), lambda bi, ti: (bi, 0)),              # c_n
            ],
            scratch_shapes=[
                pltpu.VMEM((BB, H), jnp.float32),   # h state
                pltpu.VMEM((BB, H), jnp.float32),   # c state
            ],
        ),
        compiler_params=pltpu.CompilerParams(
            # batch tiles are independent (megacore / v7x 2nd TC); time is serial.
            dimension_semantics=("parallel", "arbitrary"),
            # 32 MiB scoped VMEM is safe on v7x (64 MiB physical) as well as
            # v5e/v6e (128 MiB); TT/BB are sized to fit comfortably under it.
            vmem_limit_bytes=32 * 1024 * 1024),
        cost_estimate=cost,
    )(x_proj, W_hh_p, h0, c0)

    # --- vocab projection on the last hidden state, tiled along batch and V ---
    TV = _pick_divisor(V, (512, 256, 128))
    BM = _pick_divisor(B_pad, (512, 256, 128, 64, 32, 16, 8))
    logits = pl.pallas_call(
        _out_proj_kernel,
        out_shape=jax.ShapeDtypeStruct((B_pad, V), jnp.float32),
        grid_spec=pltpu.PrefetchScalarGridSpec(
            num_scalar_prefetch=0,
            grid=(B_pad // BM, V // TV),
            in_specs=[
                pl.BlockSpec((BM, H), lambda i, j: (i, 0)),   # h_n tile
                pl.BlockSpec((H, TV), lambda i, j: (0, j)),   # W_out tile
                pl.BlockSpec((1, TV), lambda i, j: (0, j)),   # b_out tile
            ],
            out_specs=pl.BlockSpec((BM, TV), lambda i, j: (i, j)),
        ),
        compiler_params=pltpu.CompilerParams(
            dimension_semantics=("parallel", "parallel"),
            vmem_limit_bytes=32 * 1024 * 1024),
    )(h_n, W_out.astype(jnp.float32), b_out.astype(jnp.float32))

    logits = logits[:B]
    h_n = h_n[:B]
    c_n = c_n[:B]
    # Match PyTorch nn.LSTM hidden shape convention: (num_layers=1, B, H)
    return logits, (h_n[None, :, :], c_n[None, :, :])


# ----------------------------------------------------------------------------
# Pure-JAX reference (standard PyTorch gate order, f32 throughout).
# ----------------------------------------------------------------------------
def _reference_forward(x_ids, params):
    emb_w = params["embedding"].astype(jnp.float32)
    W_ih = params["W_ih"].astype(jnp.float32)
    W_hh = params["W_hh"].astype(jnp.float32)
    W_out = params["W_out"].astype(jnp.float32)
    b, b_out = params["b"].astype(jnp.float32), params["b_out"].astype(jnp.float32)
    H = params["W_hh"].shape[0]
    B = x_ids.shape[0]

    x_emb = jnp.take(emb_w, x_ids, axis=0)                                 # (B, T, E)
    x_proj = jnp.einsum("bte,eg->tbg", x_emb, W_ih,
                        preferred_element_type=jnp.float32) + b            # (T, B, 4H)

    def step(carry, xp_t):
        h, c = carry
        gates = xp_t + jnp.dot(h, W_hh, preferred_element_type=jnp.float32)
        i = jax.nn.sigmoid(gates[:, 0 * H:1 * H])
        f = jax.nn.sigmoid(gates[:, 1 * H:2 * H])
        g = jnp.tanh(gates[:, 2 * H:3 * H])
        o = jax.nn.sigmoid(gates[:, 3 * H:4 * H])
        c = f * c + i * g
        h = o * jnp.tanh(c)
        return (h, c), None

    init = (jnp.zeros((B, H), jnp.float32), jnp.zeros((B, H), jnp.float32))
    (h, c), _ = jax.lax.scan(step, init, x_proj)
    logits = jnp.dot(h, W_out, preferred_element_type=jnp.float32) + b_out
    return logits, (h[None], c[None])


def init_params(key, vocab_size, embedding_size, hidden_size):
    k = jax.random.split(key, 7)
    s = 1.0 / jnp.sqrt(hidden_size)
    u = lambda kk, shape: jax.random.uniform(kk, shape, jnp.float32, -s, s)
    return {
        "embedding": jax.random.normal(k[0], (vocab_size, embedding_size), jnp.float32),
        "W_ih": u(k[1], (embedding_size, 4 * hidden_size)),
        "W_hh": u(k[2], (hidden_size, 4 * hidden_size)),
        "b": u(k[3], (1, 4 * hidden_size)) + u(k[4], (1, 4 * hidden_size)),
        "W_out": u(k[5], (hidden_size, vocab_size)),
        "b_out": u(k[6], (1, vocab_size)),
    }


if __name__ == "__main__":
    # Small, TPU-friendly demo shapes: H/V lane-aligned (128), B a sublane multiple.
    VOCAB, EMB, HID = 128, 64, 128
    B, T = 16, 16

    key = jax.random.PRNGKey(0)
    pkey, xkey = jax.random.split(key)
    params = init_params(pkey, VOCAB, EMB, HID)
    x_ids = jax.random.randint(xkey, (B, T), 0, VOCAB, dtype=jnp.int32)

    logits, (h_n, c_n) = jax.jit(simple_lstm_forward)(x_ids, params)
    jax.block_until_ready((logits, h_n, c_n))

    # Validate against the pure-JAX reference.
    ref_logits, (ref_h, ref_c) = _reference_forward(x_ids, params)
    assert jnp.allclose(logits, ref_logits, atol=1e-3, rtol=1e-3)
    assert jnp.allclose(h_n, ref_h, atol=1e-3, rtol=1e-3)
    assert jnp.allclose(c_n, ref_c, atol=1e-3, rtol=1e-3)

    print("KERNEL_OK")
</pallas_src>

<mosaic_0001>
module attributes {stable_mosaic.version = 11 : i64} {
  func.func @_lstm_recurrence_kernel(%arg0: i32, %arg1: i32, %arg2: memref<8x16x512xf32, #tpu.memory_space<vmem>>, %arg3: memref<128x512xf32, #tpu.memory_space<vmem>>, %arg4: memref<16x128xf32, #tpu.memory_space<vmem>>, %arg5: memref<16x128xf32, #tpu.memory_space<vmem>>, %arg6: memref<16x128xf32, #tpu.memory_space<vmem>>, %arg7: memref<16x128xf32, #tpu.memory_space<vmem>>, %arg8: memref<16x128xf32, #tpu.memory_space<vmem>>, %arg9: memref<16x128xf32, #tpu.memory_space<vmem>>) attributes {dimension_semantics = [#tpu.dimension_semantics<parallel>, #tpu.dimension_semantics<arbitrary>], iteration_bounds = array<i64: 1, 2>, scalar_prefetch = 0 : i64, scratch_operands = 2 : i64, tpu.core_type = #tpu.core_type<tc>, window_params = [{transform_indices = @transform_0, window_bounds = array<i64: 8, 16, 512>}, {pipeline_mode = #tpu.pipeline_mode<synchronous>, transform_indices = @transform_1, window_bounds = array<i64: 128, 512>}, {transform_indices = @transform_2, window_bounds = array<i64: 16, 128>}, {transform_indices = @transform_3, window_bounds = array<i64: 16, 128>}, {transform_indices = @transform_4, window_bounds = array<i64: 16, 128>}, {transform_indices = @transform_5, window_bounds = array<i64: 16, 128>}]} {
    %c0_i32 = arith.constant 0 : i32
    %0 = arith.cmpi eq, %arg1, %c0_i32 : i32
    %1 = arith.extui %0 : i1 to i32
    %c0_i32_0 = arith.constant 0 : i32
    %2 = arith.cmpi ne, %1, %c0_i32_0 : i32
    scf.if %2 {
      %c0_44 = arith.constant 0 : index
      %c0_45 = arith.constant 0 : index
      %179 = vector.load %arg4[%c0_44, %c0_45] : memref<16x128xf32, #tpu.memory_space<vmem>>, vector<16x128xf32>
      %c0_46 = arith.constant 0 : index
      %c0_47 = arith.constant 0 : index
      %180 = vector.load %arg8[%c0_46, %c0_47] : memref<16x128xf32, #tpu.memory_space<vmem>>, vector<16x128xf32>
      tpu.vector_store %arg8[%c0_46, %c0_47], %179 {strides = array<i32>} : memref<16x128xf32, #tpu.memory_space<vmem>>, vector<16x128xf32>,
      %c0_48 = arith.constant 0 : index
      %c0_49 = arith.constant 0 : index
      %181 = vector.load %arg5[%c0_48, %c0_49] : memref<16x128xf32, #tpu.memory_space<vmem>>, vector<16x128xf32>
      %c0_50 = arith.constant 0 : index
      %c0_51 = arith.constant 0 : index
      %182 = vector.load %arg9[%c0_50, %c0_51] : memref<16x128xf32, #tpu.memory_space<vmem>>, vector<16x128xf32>
      tpu.vector_store %arg9[%c0_50, %c0_51], %181 {strides = array<i32>} : memref<16x128xf32, #tpu.memory_space<vmem>>, vector<16x128xf32>,
    } else {
    }
    %c0 = arith.constant 0 : index
    %c0_1 = arith.constant 0 : index
    %3 = vector.load %arg3[%c0, %c0_1] : memref<128x512xf32, #tpu.memory_space<vmem>>, vector<128x512xf32>
    %c0_2 = arith.constant 0 : index
    %c0_3 = arith.constant 0 : index
    %4 = vector.load %arg8[%c0_2, %c0_3] : memref<16x128xf32, #tpu.memory_space<vmem>>, vector<16x128xf32>
    %c0_4 = arith.constant 0 : index
    %c0_5 = arith.constant 0 : index
    %5 = vector.load %arg9[%c0_4, %c0_5] : memref<16x128xf32, #tpu.memory_space<vmem>>, vector<16x128xf32>
    %c0_i32_6 = arith.constant 0 : i32
    %6 = arith.index_cast %c0_i32_6 : i32 to index
    %c0_7 = arith.constant 0 : index
    %c0_8 = arith.constant 0 : index
    %7 = vector.load %arg2[%6, %c0_7, %c0_8] : memref<8x16x512xf32, #tpu.memory_space<vmem>>, vector<1x16x512xf32>
    %8 = vector.shape_cast %7 : vector<1x16x512xf32> to vector<16x512xf32>
    %cst = arith.constant dense<0.000000e+00> : vector<16x512xf32>
    %9 = tpu.matmul %4, %3, %cst {dimension_numbers = #tpu.dot_dimension_numbers<[1], [0], [0], [1], [0, 0, 1, 1], [], []>} : vector<16x128xf32>, vector<128x512xf32>, vector<16x512xf32> -> vector<16x512xf32>
    %10 = arith.addf %8, %9 : vector<16x512xf32>
    %11 = vector.extract_strided_slice %10 {offsets = [0, 0], sizes = [16, 384], strides = [1, 1]} : vector<16x512xf32> to vector<16x384xf32>
    %12 = arith.negf %11 : vector<16x384xf32>
    %13 = math.exp %12 : vector<16x384xf32>
    %cst_9 = arith.constant 1.000000e+00 : f32
    %14 = vector.broadcast %cst_9 : f32 to vector<16x384xf32>
    %15 = arith.addf %14, %13 : vector<16x384xf32>
    %16 = arith.divf %14, %15 : vector<16x384xf32>
    %17 = vector.extract_strided_slice %16 {offsets = [0, 0], sizes = [16, 128], strides = [1, 1]} : vector<16x384xf32> to vector<16x128xf32>
    %18 = vector.extract_strided_slice %16 {offsets = [0, 128], sizes = [16, 128], strides = [1, 1]} : vector<16x384xf32> to vector<16x128xf32>
    %19 = vector.extract_strided_slice %16 {offsets = [0, 256], sizes = [16, 128], strides = [1, 1]} : vector<16x384xf32> to vector<16x128xf32>
    %20 = vector.extract_strided_slice %10 {offsets = [0, 384], sizes = [16, 128], strides = [1, 1]} : vector<16x512xf32> to vector<16x128xf32>
    %21 = math.tanh %20 : vector<16x128xf32>
    %22 = arith.mulf %18, %5 : vector<16x128xf32>
    %23 = arith.mulf %17, %21 : vector<16x128xf32>
    %24 = arith.addf %22, %23 : vector<16x128xf32>
    %25 = math.tanh %24 : vector<16x128xf32>
    %26 = arith.mulf %19, %25 : vector<16x128xf32>
    %c1_i32 = arith.constant 1 : i32
    %27 = arith.index_cast %c1_i32 : i32 to index
    %c0_10 = arith.constant 0 : index
    %c0_11 = arith.constant 0 : index
    %28 = vector.load %arg2[%27, %c0_10, %c0_11] : memref<8x16x512xf32, #tpu.memory_space<vmem>>, vector<1x16x512xf32>
    %29 = vector.shape_cast %28 : vector<1x16x512xf32> to vector<16x512xf32>
    %cst_12 = arith.constant dense<0.000000e+00> : vector<16x512xf32>
    %30 = tpu.matmul %26, %3, %cst_12 {dimension_numbers = #tpu.dot_dimension_numbers<[1], [0], [0], [1], [0, 0, 1, 1], [], []>} : vector<16x128xf32>, vector<128x512xf32>, vector<16x512xf32> -> vector<16x512xf32>
    %31 = arith.addf %29, %30 : vector<16x512xf32>
    %32 = vector.extract_strided_slice %31 {offsets = [0, 0], sizes = [16, 384], strides = [1, 1]} : vector<16x512xf32> to vector<16x384xf32>
    %33 = arith.negf %32 : vector<16x384xf32>
    %34 = math.exp %33 : vector<16x384xf32>
    %cst_13 = arith.constant 1.000000e+00 : f32
    %35 = vector.broadcast %cst_13 : f32 to vector<16x384xf32>
    %36 = arith.addf %35, %34 : vector<16x384xf32>
    %37 = arith.divf %35, %36 : vector<16x384xf32>
    %38 = vector.extract_strided_slice %37 {offsets = [0, 0], sizes = [16, 128], strides = [1, 1]} : vector<16x384xf32> to vector<16x128xf32>
    %39 = vector.extract_strided_slice %37 {offsets = [0, 128], sizes = [16, 128], strides = [1, 1]} : vector<16x384xf32> to vector<16x128xf32>
    %40 = vector.extract_strided_slice %37 {offsets = [0, 256], sizes = [16, 128], strides = [1, 1]} : vector<16x384xf32> to vector<16x128xf32>
    %41 = vector.extract_strided_slice %31 {offsets = [0, 384], sizes = [16, 128], strides = [1, 1]} : vector<16x512xf32> to vector<16x128xf32>
    %42 = math.tanh %41 : vector<16x128xf32>
    %43 = arith.mulf %39, %24 : vector<16x128xf32>
    %44 = arith.mulf %38, %42 : vector<16x128xf32>
    %45 = arith.addf %43, %44 : vector<16x128xf32>
    %46 = math.tanh %45 : vector<16x128xf32>
    %47 = arith.mulf %40, %46 : vector<16x128xf32>
    %c2_i32 = arith.constant 2 : i32
    %48 = arith.index_cast %c2_i32 : i32 to index
    %c0_14 = arith.constant 0 : index
    %c0_15 = arith.constant 0 : index
    %49 = vector.load %arg2[%48, %c0_14, %c0_15] : memref<8x16x512xf32, #tpu.memory_space<vmem>>, vector<1x16x512xf32>
    %50 = vector.shape_cast %49 : vector<1x16x512xf32> to vector<16x512xf32>
    %cst_16 = arith.constant dense<0.000000e+00> : vector<16x512xf32>
    %51 = tpu.matmul %47, %3, %cst_16 {dimension_numbers = #tpu.dot_dimension_numbers<[1], [0], [0], [1], [0, 0, 1, 1], [], []>} : vector<16x128xf32>, vector<128x512xf32>, vector<16x512xf32> -> vector<16x512xf32>
    %52 = arith.addf %50, %51 : vector<16x512xf32>
    %53 = vector.extract_strided_slice %52 {offsets = [0, 0], sizes = [16, 384], strides = [1, 1]} : vector<16x512xf32> to vector<16x384xf32>
    %54 = arith.negf %53 : vector<16x384xf32>
    %55 = math.exp %54 : vector<16x384xf32>
    %cst_17 = arith.constant 1.000000e+00 : f32
    %56 = vector.broadcast %cst_17 : f32 to vector<16x384xf32>
    %57 = arith.addf %56, %55 : vector<16x384xf32>
    %58 = arith.divf %56, %57 : vector<16x384xf32>
    %59 = vector.extract_strided_slice %58 {offsets = [0, 0], sizes = [16, 128], strides = [1, 1]} : vector<16x384xf32> to vector<16x128xf32>
    %60 = vector.extract_strided_slice %58 {offsets = [0, 128], sizes = [16, 128], strides = [1, 1]} : vector<16x384xf32> to vector<16x128xf32>
    %61 = vector.extract_strided_slice %58 {offsets = [0, 256], sizes = [16, 128], strides = [1, 1]} : vector<16x384xf32> to vector<16x128xf32>
    %62 = vector.extract_strided_slice %52 {offsets = [0, 384], sizes = [16, 128], strides = [1, 1]} : vector<16x512xf32> to vector<16x128xf32>
    %63 = math.tanh %62 : vector<16x128xf32>
    %64 = arith.mulf %60, %45 : vector<16x128xf32>
    %65 = arith.mulf %59, %63 : vector<16x128xf32>
    %66 = arith.addf %64, %65 : vector<16x128xf32>
    %67 = math.tanh %66 : vector<16x128xf32>
    %68 = arith.mulf %61, %67 : vector<16x128xf32>
    %c3_i32 = arith.constant 3 : i32
    %69 = arith.index_cast %c3_i32 : i32 to index
    %c0_18 = arith.constant 0 : index
    %c0_19 = arith.constant 0 : index
    %70 = vector.load %arg2[%69, %c0_18, %c0_19] : memref<8x16x512xf32, #tpu.memory_space<vmem>>, vector<1x16x512xf32>
    %71 = vector.shape_cast %70 : vector<1x16x512xf32> to vector<16x512xf32>
    %cst_20 = arith.constant dense<0.000000e+00> : vector<16x512xf32>
    %72 = tpu.matmul %68, %3, %cst_20 {dimension_numbers = #tpu.dot_dimension_numbers<[1], [0], [0], [1], [0, 0, 1, 1], [], []>} : vector<16x128xf32>, vector<128x512xf32>, vector<16x512xf32> -> vector<16x512xf32>
    %73 = arith.addf %71, %72 : vector<16x512xf32>
    %74 = vector.extract_strided_slice %73 {offsets = [0, 0], sizes = [16, 384], strides = [1, 1]} : vector<16x512xf32> to vector<16x384xf32>
    %75 = arith.negf %74 : vector<16x384xf32>
    %76 = math.exp %75 : vector<16x384xf32>
    %cst_21 = arith.constant 1.000000e+00 : f32
    %77 = vector.broadcast %cst_21 : f32 to vector<16x384xf32>
    %78 = arith.addf %77, %76 : vector<16x384xf32>
    %79 = arith.divf %77, %78 : vector<16x384xf32>
    %80 = vector.extract_strided_slice %79 {offsets = [0, 0], sizes = [16, 128], strides = [1, 1]} : vector<16x384xf32> to vector<16x128xf32>
    %81 = vector.extract_strided_slice %79 {offsets = [0, 128], sizes = [16, 128], strides = [1, 1]} : vector<16x384xf32> to vector<16x128xf32>
    %82 = vector.extract_strided_slice %79 {offsets = [0, 256], sizes = [16, 128], strides = [1, 1]} : vector<16x384xf32> to vector<16x128xf32>
    %83 = vector.extract_strided_slice %73 {offsets = [0, 384], sizes = [16, 128], strides = [1, 1]} : vector<16x512xf32> to vector<16x128xf32>
    %84 = math.tanh %83 : vector<16x128xf32>
    %85 = arith.mulf %81, %66 : vector<16x128xf32>
    %86 = arith.mulf %80, %84 : vector<16x128xf32>
    %87 = arith.addf %85, %86 : vector<16x128xf32>
    %88 = math.tanh %87 : vector<16x128xf32>
    %89 = arith.mulf %82, %88 : vector<16x128xf32>
    %c4_i32 = arith.constant 4 : i32
    %90 = arith.index_cast %c4_i32 : i32 to index
    %c0_22 = arith.constant 0 : index
    %c0_23 = arith.constant 0 : index
    %91 = vector.load %arg2[%90, %c0_22, %c0_23] : memref<8x16x512xf32, #tpu.memory_space<vmem>>, vector<1x16x512xf32>
    %92 = vector.shape_cast %91 : vector<1x16x512xf32> to vector<16x512xf32>
    %cst_24 = arith.constant dense<0.000000e+00> : vector<16x512xf32>
    %93 = tpu.matmul %89, %3, %cst_24 {dimension_numbers = #tpu.dot_dimension_numbers<[1], [0], [0], [1], [0, 0, 1, 1], [], []>} : vector<16x128xf32>, vector<128x512xf32>, vector<16x512xf32> -> vector<16x512xf32>
    %94 = arith.addf %92, %93 : vector<16x512xf32>
    %95 = vector.extract_strided_slice %94 {offsets = [0, 0], sizes = [16, 384], strides = [1, 1]} : vector<16x512xf32> to vector<16x384xf32>
    %96 = arith.negf %95 : vector<16x384xf32>
    %97 = math.exp %96 : vector<16x384xf32>
    %cst_25 = arith.constant 1.000000e+00 : f32
    %98 = vector.broadcast %cst_25 : f32 to vector<16x384xf32>
    %99 = arith.addf %98, %97 : vector<16x384xf32>
    %100 = arith.divf %98, %99 : vector<16x384xf32>
    %101 = vector.extract_strided_slice %100 {offsets = [0, 0], sizes = [16, 128], strides = [1, 1]} : vector<16x384xf32> to vector<16x128xf32>
    %102 = vector.extract_strided_slice %100 {offsets = [0, 128], sizes = [16, 128], strides = [1, 1]} : vector<16x384xf32> to vector<16x128xf32>
    %103 = vector.extract_strided_slice %100 {offsets = [0, 256], sizes = [16, 128], strides = [1, 1]} : vector<16x384xf32> to vector<16x128xf32>
    %104 = vector.extract_strided_slice %94 {offsets = [0, 384], sizes = [16, 128], strides = [1, 1]} : vector<16x512xf32> to vector<16x128xf32>
    %105 = math.tanh %104 : vector<16x128xf32>
    %106 = arith.mulf %102, %87 : vector<16x128xf32>
    %107 = arith.mulf %101, %105 : vector<16x128xf32>
    %108 = arith.addf %106, %107 : vector<16x128xf32>
    %109 = math.tanh %108 : vector<16x128xf32>
    %110 = arith.mulf %103, %109 : vector<16x128xf32>
    %c5_i32 = arith.constant 5 : i32
    %111 = arith.index_cast %c5_i32 : i32 to index
    %c0_26 = arith.constant 0 : index
    %c0_27 = arith.constant 0 : index
    %112 = vector.load %arg2[%111, %c0_26, %c0_27] : memref<8x16x512xf32, #tpu.memory_space<vmem>>, vector<1x16x512xf32>
    %113 = vector.shape_cast %112 : vector<1x16x512xf32> to vector<16x512xf32>
    %cst_28 = arith.constant dense<0.000000e+00> : vector<16x512xf32>
    %114 = tpu.matmul %110, %3, %cst_28 {dimension_numbers = #tpu.dot_dimension_numbers<[1], [0], [0], [1], [0, 0, 1, 1], [], []>} : vector<16x128xf32>, vector<128x512xf32>, vector<16x512xf32> -> vector<16x512xf32>
    %115 = arith.addf %113, %114 : vector<16x512xf32>
    %116 = vector.extract_strided_slice %115 {offsets = [0, 0], sizes = [16, 384], strides = [1, 1]} : vector<16x512xf32> to vector<16x384xf32>
    %117 = arith.negf %116 : vector<16x384xf32>
    %118 = math.exp %117 : vector<16x384xf32>
    %cst_29 = arith.constant 1.000000e+00 : f32
    %119 = vector.broadcast %cst_29 : f32 to vector<16x384xf32>
    %120 = arith.addf %119, %118 : vector<16x384xf32>
    %121 = arith.divf %119, %120 : vector<16x384xf32>
    %122 = vector.extract_strided_slice %121 {offsets = [0, 0], sizes = [16, 128], strides = [1, 1]} : vector<16x384xf32> to vector<16x128xf32>
    %123 = vector.extract_strided_slice %121 {offsets = [0, 128], sizes = [16, 128], strides = [1, 1]} : vector<16x384xf32> to vector<16x128xf32>
    %124 = vector.extract_strided_slice %121 {offsets = [0, 256], sizes = [16, 128], strides = [1, 1]} : vector<16x384xf32> to vector<16x128xf32>
    %125 = vector.extract_strided_slice %115 {offsets = [0, 384], sizes = [16, 128], strides = [1, 1]} : vector<16x512xf32> to vector<16x128xf32>
    %126 = math.tanh %125 : vector<16x128xf32>
    %127 = arith.mulf %123, %108 : vector<16x128xf32>
    %128 = arith.mulf %122, %126 : vector<16x128xf32>
    %129 = arith.addf %127, %128 : vector<16x128xf32>
    %130 = math.tanh %129 : vector<16x128xf32>
    %131 = arith.mulf %124, %130 : vector<16x128xf32>
    %c6_i32 = arith.constant 6 : i32
    %132 = arith.index_cast %c6_i32 : i32 to index
    %c0_30 = arith.constant 0 : index
    %c0_31 = arith.constant 0 : index
    %133 = vector.load %arg2[%132, %c0_30, %c0_31] : memref<8x16x512xf32, #tpu.memory_space<vmem>>, vector<1x16x512xf32>
    %134 = vector.shape_cast %133 : vector<1x16x512xf32> to vector<16x512xf32>
    %cst_32 = arith.constant dense<0.000000e+00> : vector<16x512xf32>
    %135 = tpu.matmul %131, %3, %cst_32 {dimension_numbers = #tpu.dot_dimension_numbers<[1], [0], [0], [1], [0, 0, 1, 1], [], []>} : vector<16x128xf32>, vector<128x512xf32>, vector<16x512xf32> -> vector<16x512xf32>
    %136 = arith.addf %134, %135 : vector<16x512xf32>
    %137 = vector.extract_strided_slice %136 {offsets = [0, 0], sizes = [16, 384], strides = [1, 1]} : vector<16x512xf32> to vector<16x384xf32>
    %138 = arith.negf %137 : vector<16x384xf32>
    %139 = math.exp %138 : vector<16x384xf32>
    %cst_33 = arith.constant 1.000000e+00 : f32
    %140 = vector.broadcast %cst_33 : f32 to vector<16x384xf32>
    %141 = arith.addf %140, %139 : vector<16x384xf32>
    %142 = arith.divf %140, %141 : vector<16x384xf32>
    %143 = vector.extract_strided_slice %142 {offsets = [0, 0], sizes = [16, 128], strides = [1, 1]} : vector<16x384xf32> to vector<16x128xf32>
    %144 = vector.extract_strided_slice %142 {offsets = [0, 128], sizes = [16, 128], strides = [1, 1]} : vector<16x384xf32> to vector<16x128xf32>
    %145 = vector.extract_strided_slice %142 {offsets = [0, 256], sizes = [16, 128], strides = [1, 1]} : vector<16x384xf32> to vector<16x128xf32>
    %146 = vector.extract_strided_slice %136 {offsets = [0, 384], sizes = [16, 128], strides = [1, 1]} : vector<16x512xf32> to vector<16x128xf32>
    %147 = math.tanh %146 : vector<16x128xf32>
    %148 = arith.mulf %144, %129 : vector<16x128xf32>
    %149 = arith.mulf %143, %147 : vector<16x128xf32>
    %150 = arith.addf %148, %149 : vector<16x128xf32>
    %151 = math.tanh %150 : vector<16x128xf32>
    %152 = arith.mulf %145, %151 : vector<16x128xf32>
    %c7_i32 = arith.constant 7 : i32
    %153 = arith.index_cast %c7_i32 : i32 to index
    %c0_34 = arith.constant 0 : index
    %c0_35 = arith.constant 0 : index
    %154 = vector.load %arg2[%153, %c0_34, %c0_35] : memref<8x16x512xf32, #tpu.memory_space<vmem>>, vector<1x16x512xf32>
    %155 = vector.shape_cast %154 : vector<1x16x512xf32> to vector<16x512xf32>
    %cst_36 = arith.constant dense<0.000000e+00> : vector<16x512xf32>
    %156 = tpu.matmul %152, %3, %cst_36 {dimension_numbers = #tpu.dot_dimension_numbers<[1], [0], [0], [1], [0, 0, 1, 1], [], []>} : vector<16x128xf32>, vector<128x512xf32>, vector<16x512xf32> -> vector<16x512xf32>
    %157 = arith.addf %155, %156 : vector<16x512xf32>
    %158 = vector.extract_strided_slice %157 {offsets = [0, 0], sizes = [16, 384], strides = [1, 1]} : vector<16x512xf32> to vector<16x384xf32>
    %159 = arith.negf %158 : vector<16x384xf32>
    %160 = math.exp %159 : vector<16x384xf32>
    %cst_37 = arith.constant 1.000000e+00 : f32
    %161 = vector.broadcast %cst_37 : f32 to vector<16x384xf32>
    %162 = arith.addf %161, %160 : vector<16x384xf32>
    %163 = arith.divf %161, %162 : vector<16x384xf32>
    %164 = vector.extract_strided_slice %163 {offsets = [0, 0], sizes = [16, 128], strides = [1, 1]} : vector<16x384xf32> to vector<16x128xf32>
    %165 = vector.extract_strided_slice %163 {offsets = [0, 128], sizes = [16, 128], strides = [1, 1]} : vector<16x384xf32> to vector<16x128xf32>
    %166 = vector.extract_strided_slice %163 {offsets = [0, 256], sizes = [16, 128], strides = [1, 1]} : vector<16x384xf32> to vector<16x128xf32>
    %167 = vector.extract_strided_slice %157 {offsets = [0, 384], sizes = [16, 128], strides = [1, 1]} : vector<16x512xf32> to vector<16x128xf32>
    %168 = math.tanh %167 : vector<16x128xf32>
    %169 = arith.mulf %165, %150 : vector<16x128xf32>
    %170 = arith.mulf %164, %168 : vector<16x128xf32>
    %171 = arith.addf %169, %170 : vector<16x128xf32>
    %172 = math.tanh %171 : vector<16x128xf32>
    %173 = arith.mulf %166, %172 : vector<16x128xf32>
    %c8_i32 = arith.constant 8 : i32
    %c0_38 = arith.constant 0 : index
    %c0_39 = arith.constant 0 : index
    %174 = vector.load %arg8[%c0_38, %c0_39] : memref<16x128xf32, #tpu.memory_space<vmem>>, vector<16x128xf32>
    tpu.vector_store %arg8[%c0_38, %c0_39], %173 {strides = array<i32>} : memref<16x128xf32, #tpu.memory_space<vmem>>, vector<16x128xf32>,
    %c0_40 = arith.constant 0 : index
    %c0_41 = arith.constant 0 : index
    %175 = vector.load %arg9[%c0_40, %c0_41] : memref<16x128xf32, #tpu.memory_space<vmem>>, vector<16x128xf32>
    tpu.vector_store %arg9[%c0_40, %c0_41], %171 {strides = array<i32>} : memref<16x128xf32, #tpu.memory_space<vmem>>, vector<16x128xf32>,
    %c1_i32_42 = arith.constant 1 : i32
    %176 = arith.cmpi eq, %arg1, %c1_i32_42 : i32
    %177 = arith.extui %176 : i1 to i32
    %c0_i32_43 = arith.constant 0 : i32
    %178 = arith.cmpi ne, %177, %c0_i32_43 : i32
    scf.if %178 {
      %c0_44 = arith.constant 0 : index
      %c0_45 = arith.constant 0 : index
      %179 = vector.load %arg6[%c0_44, %c0_45] : memref<16x128xf32, #tpu.memory_space<vmem>>, vector<16x128xf32>
      tpu.vector_store %arg6[%c0_44, %c0_45], %173 {strides = array<i32>} : memref<16x128xf32, #tpu.memory_space<vmem>>, vector<16x128xf32>,
      %c0_46 = arith.constant 0 : index
      %c0_47 = arith.constant 0 : index
      %180 = vector.load %arg7[%c0_46, %c0_47] : memref<16x128xf32, #tpu.memory_space<vmem>>, vector<16x128xf32>
      tpu.vector_store %arg7[%c0_46, %c0_47], %171 {strides = array<i32>} : memref<16x128xf32, #tpu.memory_space<vmem>>, vector<16x128xf32>,
    } else {
    }
    return
  }
  func.func @transform_0(%arg0: i32, %arg1: i32) -> (i32, i32, i32) {
    %c0_i32 = arith.constant 0 : i32
    %c0_i32_0 = arith.constant 0 : i32
    return %arg1, %arg0, %c0_i32 : i32, i32, i32
  }
  func.func @transform_1(%arg0: i32, %arg1: i32) -> (i32, i32) {
    %c0_i32 = arith.constant 0 : i32
    %c0_i32_0 = arith.constant 0 : i32
    %c0_i32_1 = arith.constant 0 : i32
    return %c0_i32, %c0_i32_0 : i32, i32
  }
  func.func @transform_2(%arg0: i32, %arg1: i32) -> (i32, i32) {
    %c0_i32 = arith.constant 0 : i32
    %c0_i32_0 = arith.constant 0 : i32
    return %arg0, %c0_i32 : i32, i32
  }
  func.func @transform_3(%arg0: i32, %arg1: i32) -> (i32, i32) {
    %c0_i32 = arith.constant 0 : i32
    %c0_i32_0 = arith.constant 0 : i32
    return %arg0, %c0_i32 : i32, i32
  }
  func.func @transform_4(%arg0: i32, %arg1: i32) -> (i32, i32) {
    %c0_i32 = arith.constant 0 : i32
    %c0_i32_0 = arith.constant 0 : i32
    return %arg0, %c0_i32 : i32, i32
  }
  func.func @transform_5(%arg0: i32, %arg1: i32) -> (i32, i32) {
    %c0_i32 = arith.constant 0 : i32
    %c0_i32_0 = arith.constant 0 : i32
    return %arg0, %c0_i32 : i32, i32
  }
}

module attributes {stable_mosaic.version = 11 : i64} {
  func.func @_out_proj_kernel(%arg0: i32, %arg1: i32, %arg2: memref<16x128xf32, #tpu.memory_space<vmem>>, %arg3: memref<128x128xf32, #tpu.memory_space<vmem>>, %arg4: memref<1x128xf32, #tpu.memory_space<vmem>>, %arg5: memref<16x128xf32, #tpu.memory_space<vmem>>) attributes {dimension_semantics = [#tpu.dimension_semantics<parallel>, #tpu.dimension_semantics<parallel>], iteration_bounds = array<i64: 1, 1>, scalar_prefetch = 0 : i64, scratch_operands = 0 : i64, tpu.core_type = #tpu.core_type<tc>, window_params = [{transform_indices = @transform_0, window_bounds = array<i64: 16, 128>}, {transform_indices = @transform_1, window_bounds = array<i64: 128, 128>}, {transform_indices = @transform_2, window_bounds = array<i64: 1, 128>}, {transform_indices = @transform_3, window_bounds = array<i64: 16, 128>}]} {
    %c0 = arith.constant 0 : index
    %c0_0 = arith.constant 0 : index
    %0 = vector.load %arg2[%c0, %c0_0] : memref<16x128xf32, #tpu.memory_space<vmem>>, vector<16x128xf32>
    %c0_1 = arith.constant 0 : index
    %c0_2 = arith.constant 0 : index
    %1 = vector.load %arg3[%c0_1, %c0_2] : memref<128x128xf32, #tpu.memory_space<vmem>>, vector<128x128xf32>
    %cst = arith.constant dense<0.000000e+00> : vector<16x128xf32>
    %2 = tpu.matmul %0, %1, %cst {dimension_numbers = #tpu.dot_dimension_numbers<[1], [0], [0], [1], [0, 0, 1, 1], [], []>} : vector<16x128xf32>, vector<128x128xf32>, vector<16x128xf32> -> vector<16x128xf32>
    %c0_3 = arith.constant 0 : index
    %c0_4 = arith.constant 0 : index
    %3 = vector.load %arg4[%c0_3, %c0_4] : memref<1x128xf32, #tpu.memory_space<vmem>>, vector<1x128xf32>
    %4 = vector.broadcast %3 : vector<1x128xf32> to vector<16x128xf32>
    %5 = arith.addf %2, %4 : vector<16x128xf32>
    %c0_5 = arith.constant 0 : index
    %c0_6 = arith.constant 0 : index
    %6 = vector.load %arg5[%c0_5, %c0_6] : memref<16x128xf32, #tpu.memory_space<vmem>>, vector<16x128xf32>
    tpu.vector_store %arg5[%c0_5, %c0_6], %5 {strides = array<i32>} : memref<16x128xf32, #tpu.memory_space<vmem>>, vector<16x128xf32>,
    return
  }
  func.func @transform_0(%arg0: i32, %arg1: i32) -> (i32, i32) {
    %c0_i32 = arith.constant 0 : i32
    %c0_i32_0 = arith.constant 0 : i32
    return %arg0, %c0_i32 : i32, i32
  }
  func.func @transform_1(%arg0: i32, %arg1: i32) -> (i32, i32) {
    %c0_i32 = arith.constant 0 : i32
    %c0_i32_0 = arith.constant 0 : i32
    return %c0_i32, %arg1 : i32, i32
  }
  func.func @transform_2(%arg0: i32, %arg1: i32) -> (i32, i32) {
    %c0_i32 = arith.constant 0 : i32
    %c0_i32_0 = arith.constant 0 : i32
    return %c0_i32, %arg1 : i32, i32
  }
  func.func @transform_3(%arg0: i32, %arg1: i32) -> (i32, i32) {
    %c0_i32 = arith.constant 0 : i32
    return %arg0, %arg1 : i32, i32
  }
}

</mosaic_0001>

<bundles_post_ra>
// kernel: simple_lstm_forward.3
= control target key start
LH: loop header
LB: loop body
LE: loop exit
PB: predicated region body
PF: predicated region fallthrough
CT: control target
= control target key end

     0   :  { %s295_s0 = inlined_call_operand.vmem [shape: f32[16,128], index: 0, kind: input, shape index: {}]   ;;  %s296_s1 = inlined_call_operand.vmem [shape: f32[128,128], index: 1, kind: input, shape index: {}]   ;;  %s297_s2 = inlined_call_operand.vmem [shape: f32[1,128], index: 2, kind: input, shape index: {}]   ;;  %s298_s3 = inlined_call_operand.hbm [shape: f32[16,128], index: 3, kind: output, shape index: {}]  }
   0x1   :  { %v32_v0 = vld [vmem:[%s296_s1 + $0x78] sm:$0xff]  ;;  %v31_v1 = vld [vmem:[%s296_s1 + $0x70] sm:$0xff]  ;;  %v30_v2 = vld [vmem:[%s296_s1 + $0x68] sm:$0xff] }
   0x2   :  { %152 = vmatprep.subr.mxu0 %v32_v0  ;;  %v29_v3 = vld [vmem:[%s296_s1 + $0x60] sm:$0xff]  ;;  %v28_v5 = vld [vmem:[%s296_s1 + $0x58] sm:$0xff] }
   0x3   :  { %153 = vmatpush3.msra.mxu0 %v32_v0  ;;  %v15_v4 = vld [vmem:[%s295_s0] sm:$0xff] }
   0x4   :  { %154 = vmatprep.subr.mxu0 %v31_v1  ;;  %184 = vmatprep.mubr.f32.mxu0 %v15_v4 }
   0x5   :  { %155 = vmatpush3.msra.mxu0 %v31_v1 }
   0x6   :  { %156 = vmatprep.subr.mxu0 %v30_v2 }
   0x7   :  { %157 = vmatpush3.msra.mxu0 %v30_v2 }
   0x8   :  { %8 = vsyncpa [#allocation3], 0  ;;  %158 = vmatprep.subr.mxu0 %v29_v3  ;;  %v27_v6 = vld [vmem:[%s296_s1 + $0x50] sm:$0xff]  ;;  %v26_v7 = vld [vmem:[%s296_s1 + $0x48] sm:$0xff]  ;;  %s212_s23 = smov [#allocation2]  }
   0x9   :  { %159 = vmatpush3.msra.mxu0 %v29_v3  ;;  %v25_v8 = vld [vmem:[%s296_s1 + $0x40] sm:$0xff]  ;;  %v24_v9 = vld [vmem:[%s296_s1 + $0x38] sm:$0xff]  ;;  %v23_v10 = vld [vmem:[%s296_s1 + $0x30] sm:$0xff]  ;;  %s122_s24 = sshll.u32 %s212_s23, 4  ;;  %s123_s24 = int_to_ptr.vmem [resolvable:$true] %s122_s24 }
   0xa   :  { %160 = vmatprep.subr.mxu0 %v28_v5  ;;  %v22_v11 = vld [vmem:[%s296_s1 + $0x28] sm:$0xff]  ;;  %v21_v12 = vld [vmem:[%s296_s1 + $0x20] sm:$0xff]  ;;  %v20_v13 = vld [vmem:[%s296_s1 + $0x18] sm:$0xff]  ;;  %p195_p1 = scmp.lt.s32.totalorder %s123_s24, %s123_s24 }
   0xb   :  { %161 = vmatpush3.msra.mxu0 %v28_v5  ;;  %v19_v14 = vld [vmem:[%s296_s1 + $0x10] sm:$0xff]  ;;  %v18_v15 = vld [vmem:[%s296_s1 + $0x8] sm:$0xff]  ;;  %v17_v16 = vld [vmem:[%s296_s1] sm:$0xff]  ;;  %s190_s1 = scalar_lea.vmem %s123_s24, 256 }
   0xc   :  { %162 = vmatprep.subr.mxu0 %v27_v6  ;;  %v16_v17 = vld [vmem:[%s295_s0 + $0x8] sm:$0xff]  ;;  %v133_v18 = vld [vmem:[%s297_s2] ss:$0 sm:$0xff]  ;;  %p191_p0 = scmp.ne.s32.totalorder %s123_s24, %s190_s1  ;;  %p196_p2 = scmp.lt.s32.totalorder %s190_s1, %s190_s1 }
   0xd   :  { %163 = vmatpush3.msra.mxu0 %v27_v6 }
   0xe   :  { %164 = vmatprep.subr.mxu0 %v26_v7  ;;  %p197_p3 = por %p196_p2, %p195_p1 }
   0xf   :  { %165 = vmatpush3.msra.mxu0 %v26_v7 }
  0x10   :  { %166 = vmatprep.subr.mxu0 %v25_v8  ;;  %p198_p4 = pnand %p197_p3, %p191_p0 }
  0x11   :  { %167 = vmatpush3.msra.mxu0 %v25_v8 }
  0x12   :  { %168 = vmatprep.subr.mxu0 %v24_v9 }
  0x13   :  { %169 = vmatpush3.msra.mxu0 %v24_v9 }
  0x14   :  { %170 = vmatprep.subr.mxu0 %v23_v10 }
  0x15   :  { %171 = vmatpush3.msra.mxu0 %v23_v10 }
  0x16   :  { %172 = vmatprep.subr.mxu0 %v22_v11 }
  0x17   :  { %173 = vmatpush3.msra.mxu0 %v22_v11 }
  0x18   :  { %174 = vmatprep.subr.mxu0 %v21_v12 }
  0x19   :  { %175 = vmatpush3.msra.mxu0 %v21_v12 }
  0x1a   :  { %176 = vmatprep.subr.mxu0 %v20_v13 }
  0x1b   :  { %177 = vmatpush3.msra.mxu0 %v20_v13 }
  0x1c   :  { %178 = vmatprep.subr.mxu0 %v19_v14 }
  0x1d   :  { %179 = vmatpush3.msra.mxu0 %v19_v14 }
  0x1e   :  { %180 = vmatprep.subr.mxu0 %v18_v15 }
  0x1f   :  { %181 = vmatpush3.msra.mxu0 %v18_v15 }
  0x20   :  { %182 = vmatprep.subr.mxu0 %v17_v16 }
  0x21   :  { %183 = vmatpush3.msra.mxu0 %v17_v16 }
  0x22   :  { %185 = vmatmul.mubr.f32.vlgmr.msra.gmra.mxu0 %v16_v17 }
  0xe2   :  { %v186_v19 = vpop.f32.mrf.mxu0 }
  0xe3   :  { %v112_v20 = vadd.f32 %v186_v19, %v133_v18 }
  0xe4   :  { %v106_v21 = vpop.f32.mrf.mxu0 }
  0xe5   :  { %116 = vst [vmem:[#allocation2 + $0x8] sm:$0xff] %v112_v20  ;;  %v107_v22 = vadd.f32 %v133_v18, %v106_v21 }
  0xe7   :  { %115 = vst [vmem:[#allocation2] sm:$0xff] %v107_v22 }
  0xe8   :  { %201 = shalt.err (!%p198_p4)
}
  0xe9   :  { %s213_s0 = smov 128   ;;  %s214_s25 = smov 8  }
  0xea   :  { %128 = dma.vmem_to_hbm [thread:$0]  %s123_s24, 256, %s298_s3, [#allocation3], %s213_s0, %s213_s0, %s214_s25  }
  0xeb   :  { %210 = dma.done.wait [#allocation3], 256  }
  0xec   :  { %211 = vsyncadd [#allocation3], 4294967040 }
  0xed   :  { %132 = vsyncpa [#allocation3], 1 }

// kernel: simple_lstm_forward.2
= control target key start
LH: loop header
LB: loop body
LE: loop exit
PB: predicated region body
PF: predicated region fallthrough
CT: control target
= control target key end

     0   :  { %11 = vsyncpa [#allocation5], 0  ;;  %s2848_s18 = smov 0   ;;  %s2850_s19 = smov 0   ;;  %s4225_s0 = inlined_call_operand.vmem [shape: f32[16,16,512], index: 0, kind: input, shape index: {}]   ;;  %s4226_s1 = inlined_call_operand.vmem [shape: f32[128,512], index: 1, kind: input, shape index: {}]   ;;  %s4227_s2 = inlined_call_operand.vmem [shape: f32[16,128], index: 2, kind: input, shape index: {}, may-alias: {2,3}]   ;;  %s4228_s3 = inlined_call_operand.vmem [shape: f32[16,128], index: 3, kind: input, shape index: {}, may-alias: {2,3}]   ;;  %s4229_s4 = inlined_call_operand.vmem [shape: f32[16,128], index: 4, kind: output, shape index: {0}]   ;;  %s4230_s5 = inlined_call_operand.hbm [shape: f32[16,128], index: 5, kind: output, shape index: {1}]  }
   0x1   :  { %s2852_s20 = smov 0  }
   0x2 LB: > { %s2286_s21 = sadd.s32 4294967295, %s2812_s20   ;;  %s26_s22 = sadd.s32 1, %s2808_s19  ;;  %s2812_s20 = sphi %s2852_s20, %s17_s20   ;;  %s2808_s19 = sphi %s2850_s19, %s4499_s19   ;;  %s2804_s18 = sphi %s2848_s18, %s4498_s18  }
   0x3   : > { %p27_p0 = scmp.ge.s32.totalorder %s26_s22, 2  ;;  %p2291_p1 = scmp.ge.s32.totalorder %s2812_s20, 1 }
   0x4   : > { %p235_p2 = scmp.lt.s32.totalorder %s2812_s20, 3 }
   0x5   : > { %s4501_s22 = smov (%p27_p0, %s26_s22), 0 }
   0x6   : > { %p236_p3 = pnand %p2291_p1, %p235_p2 }
   0x8   : > { %239 = sbr.rel (%p236_p3) target bundleno = 2071 (0x817), region = 36 }
   0xd   : > { %s2292_s23 = sshll.u32 %s2804_s18, 3  ;;  %p2295_p5 = scmp.ne.s32.totalorder %s2804_s18, 0 }
   0xe   : > { %p281_p4 = scmp.lt.s32.totalorder %s2292_s23, 15 }
   0xf   : > { %314 = sbr.rel (%p2295_p5) target bundleno = 23 (0x17), region = 40 }
  0x10   : > { %s4503_s23 = smov (!%p281_p4, %s2292_s23), 15 }
  0x11   : > { %s2407_s24 = sshll.u32 %s4503_s23, 6 }
  0x12   : > { %s2873_s27 = scalar_lea.vmem %s4225_s0, %s2407_s24 }
  0x14   : > { %v315_v0 = vld [vmem:[%s4227_s2] sm:$0xff]  ;;  %v316_v1 = vld [vmem:[%s4227_s2 + $0x8] sm:$0xff] }
  0x15   : > { %v319_v2 = vld [vmem:[%s4228_s3] sm:$0xff]  ;;  %317 = vst [vmem:[#allocation2] sm:$0xff] %v315_v0  ;;  %318 = vst [vmem:[#allocation2 + $0x8] sm:$0xff] %v316_v1  ;;  %v320_v3 = vld [vmem:[%s4228_s3 + $0x8] sm:$0xff] }
  0x16   : > { %321 = vst [vmem:[#allocation3 + $0x8] sm:$0xff] %v319_v2  ;;  %322 = vst [vmem:[#allocation3] sm:$0xff] %v320_v3 }
  0x17 PF: > { %v2891_v4 = vld [vmem:[%s4226_s1 + $0x1e8] sm:$0xff]  ;;  %v2896_v5 = vld [vmem:[%s4226_s1 + $0x1e0] sm:$0xff]  ;;  %v4231_v8 = vmov 0.0   ;;  %v2938_v13 = vld [vmem:[%s4226_s1 + $0x1f8] sm:$0xff]  ;;  %p2400_p6 = scmp.ne.s32.totalorder %s2804_s18, 1 }
  0x18   : > { %4328 = vst [vmem:[#allocation7_spill] sm:$0xff] %v2891_v4  ;;  %v2901_v6 = vld [vmem:[%s4226_s1 + $0x1c8] sm:$0xff]  ;;  %399 = vmatprep.subr.mxu0 %v2891_v4  ;;  %v2907_v7 = vld [vmem:[%s4226_s1 + $0x1c0] sm:$0xff]  ;;  %463 = vmatprep.mubr.f32.mxu0 %v4231_v8  ;;  %4329 = vst [vmem:[#allocation8_spill] sm:$0xff] %v2938_v13 }
  0x19   : > { %400 = vmatpush1.msra.mxu0 %v2896_v5  ;;  %v2914_v9 = vld [vmem:[%s4226_s1 + $0x1a8] sm:$0xff]  ;;  %540 = vmatprep.mubr.f32.mxu1 %v4231_v8  ;;  %v2921_v10 = vld [vmem:[%s4226_s1 + $0x1a0] sm:$0xff]  ;;  %v2950_v15 = vld [vmem:[%s4226_s1 + $0x1f0] sm:$0xff] }
  0x1a   : > { %401 = vmatprep.subr.mxu0 %v2901_v6  ;;  %v2927_v11 = vld [vmem:[%s4226_s1 + $0x188] sm:$0xff]  ;;  %v2933_v12 = vld [vmem:[%s4226_s1 + $0x180] sm:$0xff]  ;;  %476 = vmatprep.subr.mxu1 %v2938_v13  ;;  %v2962_v17 = vld [vmem:[%s4226_s1 + $0x1d8] sm:$0xff] }
  0x1b   : > { %402 = vmatpush1.msra.mxu0 %v2907_v7  ;;  %v2944_v14 = vld [vmem:[%s4226_s1 + $0x168] sm:$0xff]  ;;  %v2956_v16 = vld [vmem:[%s4226_s1 + $0x160] sm:$0xff]  ;;  %477 = vmatpush1.msra.mxu1 %v2950_v15  ;;  %v2967_v18 = vld [vmem:[%s4226_s1 + $0x1d0] sm:$0xff] }
  0x1c   : > { %403 = vmatprep.subr.mxu0 %v2914_v9  ;;  %v2973_v19 = vld [vmem:[%s4226_s1 + $0x148] sm:$0xff]  ;;  %478 = vmatprep.subr.mxu1 %v2962_v17  ;;  %v2979_v20 = vld [vmem:[%s4226_s1 + $0x1b8] sm:$0xff]  ;;  %v2985_v21 = vld [vmem:[%s4226_s1 + $0x140] sm:$0xff] }
  0x1d   : > { %404 = vmatpush1.msra.mxu0 %v2921_v10  ;;  %479 = vmatpush1.msra.mxu1 %v2967_v18  ;;  %v2991_v22 = vld [vmem:[%s4226_s1 + $0x1b0] sm:$0xff]  ;;  %v2996_v23 = vld [vmem:[%s4226_s1 + $0x198] sm:$0xff]  ;;  %v3002_v24 = vld [vmem:[%s4226_s1 + $0x128] sm:$0xff] }
  0x1e   : > { %405 = vmatprep.subr.mxu0 %v2927_v11  ;;  %480 = vmatprep.subr.mxu1 %v2979_v20  ;;  %v3008_v25 = vld [vmem:[%s4226_s1 + $0x190] sm:$0xff]  ;;  %v3014_v26 = vld [vmem:[%s4226_s1 + $0x120] sm:$0xff]  ;;  %v3020_v27 = vld [vmem:[%s4226_s1 + $0x178] sm:$0xff] }
  0x1f   : > { %406 = vmatpush1.msra.mxu0 %v2933_v12  ;;  %481 = vmatpush1.msra.mxu1 %v2991_v22  ;;  %v3026_v28 = vld [vmem:[%s4226_s1 + $0x108] sm:$0xff]  ;;  %v3032_v29 = vld [vmem:[%s4226_s1 + $0x170] sm:$0xff]  ;;  %v3038_v30 = vld [vmem:[%s4226_s1 + $0x100] sm:$0xff] }
  0x20   : > { %407 = vmatprep.subr.mxu0 %v2944_v14  ;;  %482 = vmatprep.subr.mxu1 %v2996_v23  ;;  %v3044_v31 = vld [vmem:[%s4226_s1 + $0x158] sm:$0xff]  ;;  %v3050_v32 = vld [vmem:[%s4226_s1 + $0xe8] sm:$0xff]  ;;  %v3056_v33 = vld [vmem:[%s4226_s1 + $0x150] sm:$0xff] }
  0x21   : > { %408 = vmatpush1.msra.mxu0 %v2956_v16  ;;  %483 = vmatpush1.msra.mxu1 %v3008_v25  ;;  %v3062_v34 = vld [vmem:[%s4226_s1 + $0xe0] sm:$0xff]  ;;  %v3068_v35 = vld [vmem:[%s4226_s1 + $0x138] sm:$0xff]  ;;  %v3074_v36 = vld [vmem:[%s4226_s1 + $0xc8] sm:$0xff] }
  0x22   : > { %409 = vmatprep.subr.mxu0 %v2973_v19  ;;  %484 = vmatprep.subr.mxu1 %v3020_v27  ;;  %v3080_v37 = vld [vmem:[%s4226_s1 + $0x130] sm:$0xff]  ;;  %v3086_v38 = vld [vmem:[%s4226_s1 + $0xc0] sm:$0xff]  ;;  %v3092_v39 = vld [vmem:[%s4226_s1 + $0x118] sm:$0xff] }
  0x23   : > { %410 = vmatpush1.msra.mxu0 %v2985_v21  ;;  %485 = vmatpush1.msra.mxu1 %v3032_v29  ;;  %v3098_v40 = vld [vmem:[%s4226_s1 + $0xa8] sm:$0xff]  ;;  %v3104_v41 = vld [vmem:[%s4226_s1 + $0x110] sm:$0xff]  ;;  %v3110_v42 = vld [vmem:[%s4226_s1 + $0xa0] sm:$0xff] }
  0x24   : > { %411 = vmatprep.subr.mxu0 %v3002_v24  ;;  %486 = vmatprep.subr.mxu1 %v3044_v31  ;;  %4330 = vst [vmem:[#allocation9_spill] sm:$0xff] %v3110_v42  ;;  %v3116_v43 = vld [vmem:[%s4226_s1 + $0xf8] sm:$0xff]  ;;  %v3122_v44 = vld [vmem:[%s4226_s1 + $0x88] sm:$0xff]  ;;  %v3128_v45 = vld [vmem:[%s4226_s1 + $0xf0] sm:$0xff] }
  0x25   : > { %412 = vmatpush1.msra.mxu0 %v3014_v26  ;;  %487 = vmatpush1.msra.mxu1 %v3056_v33  ;;  %4331 = vst [vmem:[#allocation10_spill] sm:$0xff] %v3122_v44  ;;  %v3134_v46 = vld [vmem:[%s4226_s1 + $0x80] sm:$0xff]  ;;  %v3140_v47 = vld [vmem:[%s4226_s1 + $0xd8] sm:$0xff]  ;;  %v3146_v48 = vld [vmem:[%s4226_s1 + $0x68] sm:$0xff] }
  0x26   : > { %413 = vmatprep.subr.mxu0 %v3026_v28  ;;  %488 = vmatprep.subr.mxu1 %v3068_v35  ;;  %4332 = vst [vmem:[#allocation11_spill] sm:$0xff] %v3134_v46  ;;  %4333 = vst [vmem:[#allocation12_spill] sm:$0xff] %v3146_v48  ;;  %v3152_v49 = vld [vmem:[%s4226_s1 + $0xd0] sm:$0xff]  ;;  %v3158_v50 = vld [vmem:[%s4226_s1 + $0x60] sm:$0xff] }
  0x27   : > { %414 = vmatpush1.msra.mxu0 %v3038_v30  ;;  %489 = vmatpush1.msra.mxu1 %v3080_v37  ;;  %4334 = vst [vmem:[#allocation13_spill] sm:$0xff] %v3158_v50  ;;  %v3164_v51 = vld [vmem:[%s4226_s1 + $0xb8] sm:$0xff]  ;;  %v3170_v52 = vld [vmem:[%s4226_s1 + $0x48] sm:$0xff]  ;;  %v3176_v53 = vld [vmem:[%s4226_s1 + $0xb0] sm:$0xff] }
  0x28   : > { %415 = vmatprep.subr.mxu0 %v3050_v32  ;;  %490 = vmatprep.subr.mxu1 %v3092_v39  ;;  %4335 = vst [vmem:[#allocation14_spill] sm:$0xff] %v3170_v52  ;;  %4336 = vst [vmem:[#allocation15_spill] sm:$0xff] %v3176_v53  ;;  %v3182_v54 = vld [vmem:[%s4226_s1 + $0x40] sm:$0xff]  ;;  %v3188_v55 = vld [vmem:[%s4226_s1 + $0x98] sm:$0xff] }
  0x29   : > { %416 = vmatpush1.msra.mxu0 %v3062_v34  ;;  %491 = vmatpush1.msra.mxu1 %v3104_v41  ;;  %4337 = vst [vmem:[#allocation16_spill] sm:$0xff] %v3182_v54  ;;  %4338 = vst [vmem:[#allocation17_spill] sm:$0xff] %v3188_v55  ;;  %v3194_v56 = vld [vmem:[%s4226_s1 + $0x28] sm:$0xff]  ;;  %v3200_v57 = vld [vmem:[%s4226_s1 + $0x90] sm:$0xff] }
  0x2a   : > { %417 = vmatprep.subr.mxu0 %v3074_v36  ;;  %492 = vmatprep.subr.mxu1 %v3116_v43  ;;  %4339 = vst [vmem:[#allocation18_spill] sm:$0xff] %v3194_v56  ;;  %4340 = vst [vmem:[#allocation19_spill] sm:$0xff] %v3200_v57  ;;  %v3206_v58 = vld [vmem:[%s4226_s1 + $0x20] sm:$0xff]  ;;  %v3212_v59 = vld [vmem:[%s4226_s1 + $0x78] sm:$0xff] }
  0x2b   : > { %418 = vmatpush1.msra.mxu0 %v3086_v38  ;;  %493 = vmatpush1.msra.mxu1 %v3128_v45  ;;  %4341 = vst [vmem:[#allocation20_spill] sm:$0xff] %v3206_v58  ;;  %4342 = vst [vmem:[#allocation21_spill] sm:$0xff] %v3212_v59  ;;  %v3218_v60 = vld [vmem:[%s4226_s1 + $0x8] sm:$0xff]  ;;  %v3224_v61 = vld [vmem:[%s4226_s1 + $0x70] sm:$0xff] }
  0x2c   : > { %419 = vmatprep.subr.mxu0 %v3098_v40  ;;  %494 = vmatprep.subr.mxu1 %v3140_v47  ;;  %4343 = vst [vmem:[#allocation22_spill] sm:$0xff] %v3218_v60  ;;  %4344 = vst [vmem:[#allocation23_spill] sm:$0xff] %v3224_v61  ;;  %v3230_v62 = vld [vmem:[%s4226_s1] sm:$0xff]  ;;  %v3236_v63 = vld [vmem:[%s4226_s1 + $0x58] sm:$0xff] }
  0x2d   : > { %420 = vmatpush1.msra.mxu0 %v3110_v42  ;;  %495 = vmatpush1.msra.mxu1 %v3152_v49  ;;  %4345 = vst [vmem:[#allocation24_spill] sm:$0xff] %v3230_v62  ;;  %4346 = vst [vmem:[#allocation25_spill] sm:$0xff] %v3236_v63  ;;  %v387_v0 = vld [vmem:[#allocation2] sm:$0xff]  ;;  %v3243_v1 = vld [vmem:[%s4226_s1 + $0x50] sm:$0xff] }
  0x2e   : > { %421 = vmatprep.subr.mxu0 %v3122_v44  ;;  %496 = vmatprep.subr.mxu1 %v3164_v51  ;;  %4347 = vst [vmem:[#allocation26_spill] sm:$0xff] %v3243_v1  ;;  %v3250_v2 = vld [vmem:[%s4226_s1 + $0x38] sm:$0xff]  ;;  %v3257_v3 = vld [vmem:[%s4226_s1 + $0x30] sm:$0xff] }
  0x2f   : > { %422 = vmatpush1.msra.mxu0 %v3134_v46  ;;  %497 = vmatpush1.msra.mxu1 %v3176_v53  ;;  %4348 = vst [vmem:[#allocation27_spill] sm:$0xff] %v3250_v2  ;;  %4349 = vst [vmem:[#allocation28_spill] sm:$0xff] %v3257_v3  ;;  %v3263_v8 = vld [vmem:[%s4226_s1 + $0x18] sm:$0xff] }
  0x30   : > { %423 = vmatprep.subr.mxu0 %v3146_v48  ;;  %498 = vmatprep.subr.mxu1 %v3188_v55  ;;  %4350 = vst [vmem:[#allocation29_spill] sm:$0xff] %v3263_v8 }
  0x31   : > { %424 = vmatpush1.msra.mxu0 %v3158_v50  ;;  %499 = vmatpush1.msra.mxu1 %v3200_v57 }
  0x32   : > { %425 = vmatprep.subr.mxu0 %v3170_v52  ;;  %500 = vmatprep.subr.mxu1 %v3212_v59 }
  0x33   : > { %426 = vmatpush1.msra.mxu0 %v3182_v54  ;;  %501 = vmatpush1.msra.mxu1 %v3224_v61 }
  0x34   : > { %427 = vmatprep.subr.mxu0 %v3194_v56  ;;  %502 = vmatprep.subr.mxu1 %v3236_v63 }
  0x35   : > { %428 = vmatpush1.msra.mxu0 %v3206_v58  ;;  %503 = vmatpush1.msra.mxu1 %v3243_v1  ;;  %v388_v58 = vld [vmem:[#allocation2 + $0x8] sm:$0xff] }
  0x36   : > { %429 = vmatprep.subr.mxu0 %v3218_v60  ;;  %v4351_v60 = vmov 0.0   ;;  %504 = vmatprep.subr.mxu1 %v3250_v2 }
  0x37   : > { %430 = vmatpush1.msra.mxu0 %v3230_v62  ;;  %v3270_v62 = vld [vmem:[%s4226_s1 + $0x10] sm:$0xff]  ;;  %505 = vmatpush1.msra.mxu1 %v3257_v3 }
  0x38   : > { %464 = vmatmul.mubr.f32.vlgmr.msra.gmra.mxu0 %v387_v0  ;;  %4352 = vst [vmem:[#allocation30_spill] sm:$0xff] %v3270_v62  ;;  %618 = vmatprep.subr.mxu0 %v2891_v4 }
  0x39   : > { %469 = vmatprep.mubr.f32.mxu0 %v4351_v60  ;;  %506 = vmatprep.subr.mxu1 %v3263_v8 }
  0x3a   : > { %619 = vmatpush1.msra.mxu0 %v2896_v5  ;;  %507 = vmatpush1.msra.mxu1 %v3270_v62 }
  0x3b   : > { %541 = vmatmul.mubr.f32.vlgmr.msra.gmra.mxu1 %v387_v0  ;;  %695 = vmatprep.subr.mxu1 %v2938_v13  ;;  %v4354_v0 = vld [vmem:[#allocation22_spill] sm:$0xff] }
  0x3c   : > { %470 = vmatmul.mubr.f32.gmra.mxu0 %v388_v58  ;;  %546 = vmatprep.mubr.f32.mxu1 %v4351_v60 }
  0x3d   : > { %696 = vmatpush1.msra.mxu1 %v2950_v15  ;;  %620 = vmatprep.subr.mxu0 %v2901_v6 }
  0x3e   : > { %697 = vmatprep.subr.mxu1 %v2962_v17  ;;  %621 = vmatpush1.msra.mxu0 %v2907_v7 }
  0x3f   : > { %698 = vmatpush1.msra.mxu1 %v2967_v18  ;;  %622 = vmatprep.subr.mxu0 %v2914_v9 }
  0x40   : > { %547 = vmatmul.mubr.f32.gmra.mxu1 %v388_v58  ;;  %699 = vmatprep.subr.mxu1 %v2979_v20  ;;  %v4353_v58 = vld [vmem:[#allocation20_spill] sm:$0xff] }
  0x41   : > { %623 = vmatpush1.msra.mxu0 %v2921_v10  ;;  %700 = vmatpush1.msra.mxu1 %v2991_v22 }
  0x42   : > { %624 = vmatprep.subr.mxu0 %v2927_v11  ;;  %701 = vmatprep.subr.mxu1 %v2996_v23 }
  0x43   : > { %625 = vmatpush1.msra.mxu0 %v2933_v12  ;;  %702 = vmatpush1.msra.mxu1 %v3008_v25 }
  0x44   : > { %626 = vmatprep.subr.mxu0 %v2944_v14  ;;  %703 = vmatprep.subr.mxu1 %v3020_v27 }
  0x45   : > { %627 = vmatpush1.msra.mxu0 %v2956_v16  ;;  %704 = vmatpush1.msra.mxu1 %v3032_v29 }
  0x46   : > { %628 = vmatprep.subr.mxu0 %v2973_v19  ;;  %705 = vmatprep.subr.mxu1 %v3044_v31 }
  0x47   : > { %629 = vmatpush1.msra.mxu0 %v2985_v21  ;;  %706 = vmatpush1.msra.mxu1 %v3056_v33 }
  0x48   : > { %630 = vmatprep.subr.mxu0 %v3002_v24  ;;  %707 = vmatprep.subr.mxu1 %v3068_v35 }
  0x49   : > { %631 = vmatpush1.msra.mxu0 %v3014_v26  ;;  %708 = vmatpush1.msra.mxu1 %v3080_v37 }
  0x4a   : > { %632 = vmatprep.subr.mxu0 %v3026_v28  ;;  %709 = vmatprep.subr.mxu1 %v3092_v39 }
  0x4b   : > { %633 = vmatpush1.msra.mxu0 %v3038_v30  ;;  %710 = vmatpush1.msra.mxu1 %v3104_v41 }
  0x4c   : > { %634 = vmatprep.subr.mxu0 %v3050_v32  ;;  %711 = vmatprep.subr.mxu1 %v3116_v43 }
  0x4d   : > { %635 = vmatpush1.msra.mxu0 %v3062_v34  ;;  %712 = vmatpush1.msra.mxu1 %v3128_v45 }
  0x4e   : > { %636 = vmatprep.subr.mxu0 %v3074_v36  ;;  %713 = vmatprep.subr.mxu1 %v3140_v47 }
  0x4f   : > { %637 = vmatpush1.msra.mxu0 %v3086_v38  ;;  %714 = vmatpush1.msra.mxu1 %v3152_v49 }
  0x50   : > { %638 = vmatprep.subr.mxu0 %v3098_v40  ;;  %715 = vmatprep.subr.mxu1 %v3164_v51 }
  0x51   : > { %639 = vmatpush1.msra.mxu0 %v3110_v42  ;;  %716 = vmatpush1.msra.mxu1 %v3176_v53 }
  0x52   : > { %640 = vmatprep.subr.mxu0 %v3122_v44  ;;  %717 = vmatprep.subr.mxu1 %v3188_v55 }
  0x53   : > { %641 = vmatpush1.msra.mxu0 %v3134_v46  ;;  %718 = vmatpush1.msra.mxu1 %v3200_v57 }
  0x54   : > { %642 = vmatprep.subr.mxu0 %v3146_v48  ;;  %719 = vmatprep.subr.mxu1 %v3212_v59  ;;  %v393_v48 = vld [vmem:[%s2873_s27 + $0x10] sm:$0xff] }
  0x55   : > { %643 = vmatpush1.msra.mxu0 %v3158_v50  ;;  %720 = vmatpush1.msra.mxu1 %v3224_v61 }
  0x56   : > { %644 = vmatprep.subr.mxu0 %v3170_v52  ;;  %721 = vmatprep.subr.mxu1 %v3236_v63  ;;  %v4355_v52 = vld [vmem:[#allocation24_spill] sm:$0xff]  ;;  %v396_v63 = vld [vmem:[%s2873_s27 + $0x28] sm:$0xff] }
  0x57   : > { %645 = vmatpush1.msra.mxu0 %v3182_v54  ;;  %722 = vmatpush1.msra.mxu1 %v3243_v1 }
  0x58   : > { %646 = vmatprep.subr.mxu0 %v3194_v56  ;;  %723 = vmatprep.subr.mxu1 %v3250_v2 }
  0x59   : > { %647 = vmatpush1.msra.mxu0 %v4353_v58  ;;  %724 = vmatpush1.msra.mxu1 %v3257_v3  ;;  %v391_v58 = vld [vmem:[%s2873_s27] sm:$0xff]  ;;  %v392_v3 = vld [vmem:[%s2873_s27 + $0x8] sm:$0xff] }
  0x5a   : > { %648 = vmatprep.subr.mxu0 %v4354_v0  ;;  %725 = vmatprep.subr.mxu1 %v3263_v8  ;;  %v395_v8 = vld [vmem:[%s2873_s27 + $0x20] sm:$0xff] }
  0x5b   : > { %649 = vmatpush1.msra.mxu0 %v4355_v52  ;;  %682 = vmatprep.mubr.f32.mxu0 %v4351_v60 }
  0x5c   : > { %726 = vmatpush1.msra.mxu1 %v3270_v62  ;;  %759 = vmatprep.mubr.f32.mxu1 %v4351_v60 }
  0x5d   : > { %837 = vmatprep.subr.mxu0 %v2891_v4  ;;  %914 = vmatprep.subr.mxu1 %v2938_v13 }
  0xf8   : > { %v465_v2 = vpop.f32.mrf.mxu0 }
  0xf9   : > { %v553_v0 = vadd.f32 %v465_v2, %v391_v58 }
  0xfa   : > { %v467_v56 = vpop.f32.mrf.mxu0 }
  0xfb   : > { %v2296_v1 = vmul.f32 -1.442695, %v553_v0  ;;  %v554_v54 = vadd.f32 %v467_v56, %v392_v3  ;;  %v542_v50 = vpop.f32.mrf.mxu1  ;;  %v397_v56 = vld [vmem:[%s2873_s27 + $0x30] sm:$0xff]  ;;  %v394_v3 = vld [vmem:[%s2873_s27 + $0x18] sm:$0xff] }
  0xfc   : > { %v471_v52 = vpop.f32.mrf.mxu0  ;;  %v555_v0 = vadd.f32 %v542_v50, %v393_v48 }
  0xfd   : > { %2442 = vpow2.f32 %v2296_v1  ;;  %v2297_v62 = vmul.f32 -1.442695, %v554_v54  ;;  %v557_v61 = vadd.f32 %v471_v52, %v395_v8  ;;  %v544_v58 = vpop.f32.mrf.mxu1  ;;  %v398_v54 = vld [vmem:[%s2873_s27 + $0x38] sm:$0xff] }
  0xfe   : > { %v473_v4 = vpop.f32.mrf.mxu0  ;;  %v2298_v55 = vmul.f32 -1.442695, %v555_v0  ;;  %v556_v1 = vadd.f32 %v544_v58, %v394_v3 }
  0xff   : > { %2444 = vpow2.f32 %v2297_v62  ;;  %v2299_v13 = vmul.f32 -1.442695, %v557_v61  ;;  %v558_v59 = vadd.f32 %v473_v4, %v396_v63 }
 0x100   : > { %v548_v57 = vpop.f32.mrf.mxu1 }
 0x101   : > { %2446 = vpow2.f32 %v2299_v13  ;;  %v2300_v2 = vmul.f32 -1.442695, %v558_v59  ;;  %v559_v46 = vadd.f32 %v548_v57, %v397_v56 }
 0x102   : > { %v550_v8 = vpop.f32.mrf.mxu1 }
 0x103   : > { %2448 = vpow2.f32 %v2300_v2  ;;  %v2301_v44 = vmul.f32 -1.442695, %v559_v46  ;;  %v560_v4 = vadd.f32 %v550_v8, %v398_v54  ;;  %v389_v46 = vld [vmem:[#allocation3 + $0x8] sm:$0xff]  ;;  %v390_v54 = vld [vmem:[#allocation3] sm:$0xff] }
 0x104   : > { %2450 = vpow2.f32 %v2298_v55 }
 0x105   : > { %2452 = vtanh.f32 %v556_v1 }
 0x10a   : > { %v2443_v52 = vpop.eup %2442 }
 0x10b   : > { %v579_v53 = vadd.f32 1.0, %v2443_v52 }
 0x10c   : > { %v2445_v61 = vpop.eup %2444 }
 0x10d   : > { %2454 = vrcp.f32 %v579_v53  ;;  %v580_v13 = vadd.f32 1.0, %v2445_v61 }
 0x10e   : > { %v2447_v59 = vpop.eup %2446  ;;  %2456 = vpow2.f32 %v2301_v44 }
 0x10f   : > { %2458 = vrcp.f32 %v580_v13  ;;  %v582_v48 = vadd.f32 1.0, %v2447_v59 }
 0x110   : > { %v2449_v50 = vpop.eup %2448  ;;  %2460 = vtanh.f32 %v560_v4 }
 0x111   : > { %2462 = vrcp.f32 %v582_v48  ;;  %v583_v57 = vadd.f32 1.0, %v2449_v50  ;;  %v2451_v62 = vpop.eup %2450 }
 0x112   : > { %v2453_v63 = vpop.eup %2452  ;;  %v581_v0 = vadd.f32 1.0, %v2451_v62 }
 0x113   : > { %2464 = vrcp.f32 %v583_v57 }
 0x114   : > { %2466 = vrcp.f32 %v581_v0  ;;  %v4360_v0 = vld [vmem:[#allocation19_spill] sm:$0xff] }
 0x11a   : > { %v2455_v2 = vpop.eup %2454 }
 0x11b   : > { %v2457_v58 = vpop.eup %2456  ;;  %v601_v53 = vmul.f32 %v2455_v2, %v2453_v63  ;;  %v4356_v2 = vld [vmem:[#allocation15_spill] sm:$0xff] }
 0x11c   : > { %v2459_v55 = vpop.eup %2458  ;;  %v584_v52 = vadd.f32 1.0, %v2457_v58  ;;  %v4358_v58 = vld [vmem:[#allocation17_spill] sm:$0xff] }
 0x11d   : > { %v2461_v56 = vpop.eup %2460  ;;  %v599_v3 = vmul.f32 %v2459_v55, %v389_v46  ;;  %v4357_v46 = vld [vmem:[#allocation10_spill] sm:$0xff]  ;;  %v4359_v55 = vld [vmem:[#allocation11_spill] sm:$0xff] }
 0x11e   : > { %v2463_v1 = vpop.eup %2462 }
 0x11f   : > { %v3352_v44 = vadd.f32 %v601_v53, %v599_v3  ;;  %v602_v4 = vmul.f32 %v2463_v1, %v2461_v56  ;;  %v4361_v56 = vld [vmem:[#allocation12_spill] sm:$0xff]  ;;  %v4362_v3 = vld [vmem:[#allocation21_spill] sm:$0xff]  ;;  %v4364_v1 = vld [vmem:[#allocation23_spill] sm:$0xff] }
 0x120   : > { %v2465_v8 = vpop.eup %2464  ;;  %v4363_v53 = vld [vmem:[#allocation13_spill] sm:$0xff] }
 0x121   : > { %2468 = vtanh.f32 %v3352_v44  ;;  %v600_v61 = vmul.f32 %v2465_v8, %v390_v54  ;;  %v2467_v59 = vpop.eup %2466  ;;  %v4365_v54 = vld [vmem:[#allocation14_spill] sm:$0xff]  ;;  %v4366_v8 = vld [vmem:[#allocation25_spill] sm:$0xff] }
 0x122   : > { %2470 = vrcp.f32 %v584_v52  ;;  %v4367_v52 = vld [vmem:[#allocation16_spill] sm:$0xff] }
 0x123   : > { %v3355_v13 = vadd.f32 %v602_v4, %v600_v61  ;;  %v4368_v61 = vld [vmem:[#allocation26_spill] sm:$0xff] }
 0x124   : > { %v4369_v4 = vld [vmem:[#allocation18_spill] sm:$0xff] }
 0x125   : > { %2472 = vtanh.f32 %v3355_v13 }
 0x12e   : > { %v2469_v48 = vpop.eup %2468 }
 0x12f   : > { %v607_v50 = vmul.f32 %v2469_v48, %v2467_v59  ;;  %v2471_v57 = vpop.eup %2470  ;;  %v4370_v59 = vld [vmem:[#allocation27_spill] sm:$0xff]  ;;  %v4371_v48 = vld [vmem:[#allocation20_spill] sm:$0xff] }
 0x131   : > { %683 = vmatmul.mubr.f32.vlgmr.msra.gmra.mxu0 %v607_v50  ;;  %760 = vmatmul.mubr.f32.vlgmr.msra.gmra.mxu1 %v607_v50  ;;  %v4372_v50 = vld [vmem:[#allocation28_spill] sm:$0xff] }
 0x132   : > { %v2473_v62 = vpop.eup %2472  ;;  %688 = vmatprep.mubr.f32.mxu0 %v4351_v60  ;;  %765 = vmatprep.mubr.f32.mxu1 %v4351_v60 }
 0x133   : > { %v608_v63 = vmul.f32 %v2473_v62, %v2471_v57  ;;  %838 = vmatpush1.msra.mxu0 %v2896_v5  ;;  %915 = vmatpush1.msra.mxu1 %v2950_v15  ;;  %v4373_v57 = vld [vmem:[#allocation22_spill] sm:$0xff]  ;;  %v4374_v62 = vld [vmem:[#allocation29_spill] sm:$0xff] }
 0x134   : > { %839 = vmatprep.subr.mxu0 %v2901_v6  ;;  %916 = vmatprep.subr.mxu1 %v2962_v17 }
 0x135   : > { %689 = vmatmul.mubr.f32.gmra.mxu0 %v608_v63  ;;  %766 = vmatmul.mubr.f32.gmra.mxu1 %v608_v63  ;;  %v4375_v63 = vld [vmem:[#allocation24_spill] sm:$0xff] }
 0x136   : > { %840 = vmatpush1.msra.mxu0 %v2907_v7  ;;  %917 = vmatpush1.msra.mxu1 %v2967_v18 }
 0x137   : > { %841 = vmatprep.subr.mxu0 %v2914_v9  ;;  %918 = vmatprep.subr.mxu1 %v2979_v20 }
 0x138   : > { %842 = vmatpush1.msra.mxu0 %v2921_v10  ;;  %919 = vmatpush1.msra.mxu1 %v2991_v22 }
 0x139   : > { %843 = vmatprep.subr.mxu0 %v2927_v11  ;;  %920 = vmatprep.subr.mxu1 %v2996_v23 }
 0x13a   : > { %844 = vmatpush1.msra.mxu0 %v2933_v12  ;;  %921 = vmatpush1.msra.mxu1 %v3008_v25 }
 0x13b   : > { %845 = vmatprep.subr.mxu0 %v2944_v14  ;;  %922 = vmatprep.subr.mxu1 %v3020_v27 }
 0x13c   : > { %846 = vmatpush1.msra.mxu0 %v2956_v16  ;;  %923 = vmatpush1.msra.mxu1 %v3032_v29 }
 0x13d   : > { %847 = vmatprep.subr.mxu0 %v2973_v19  ;;  %924 = vmatprep.subr.mxu1 %v3044_v31 }
 0x13e   : > { %848 = vmatpush1.msra.mxu0 %v2985_v21  ;;  %925 = vmatpush1.msra.mxu1 %v3056_v33 }
 0x13f   : > { %849 = vmatprep.subr.mxu0 %v3002_v24  ;;  %926 = vmatprep.subr.mxu1 %v3068_v35 }
 0x140   : > { %850 = vmatpush1.msra.mxu0 %v3014_v26  ;;  %927 = vmatpush1.msra.mxu1 %v3080_v37 }
 0x141   : > { %851 = vmatprep.subr.mxu0 %v3026_v28  ;;  %928 = vmatprep.subr.mxu1 %v3092_v39 }
 0x142   : > { %852 = vmatpush1.msra.mxu0 %v3038_v30  ;;  %929 = vmatpush1.msra.mxu1 %v3104_v41 }
 0x143   : > { %853 = vmatprep.subr.mxu0 %v3050_v32  ;;  %930 = vmatprep.subr.mxu1 %v3116_v43 }
 0x144   : > { %854 = vmatpush1.msra.mxu0 %v3062_v34  ;;  %931 = vmatpush1.msra.mxu1 %v3128_v45 }
 0x145   : > { %855 = vmatprep.subr.mxu0 %v3074_v36  ;;  %932 = vmatprep.subr.mxu1 %v3140_v47 }
 0x146   : > { %856 = vmatpush1.msra.mxu0 %v3086_v38  ;;  %933 = vmatpush1.msra.mxu1 %v3152_v49 }
 0x147   : > { %857 = vmatprep.subr.mxu0 %v3098_v40  ;;  %934 = vmatprep.subr.mxu1 %v3164_v51 }
 0x148   : > { %858 = vmatpush1.msra.mxu0 %v3110_v42  ;;  %935 = vmatpush1.msra.mxu1 %v4356_v2 }
 0x149   : > { %859 = vmatprep.subr.mxu0 %v4357_v46  ;;  %936 = vmatprep.subr.mxu1 %v4358_v58 }
 0x14a   : > { %860 = vmatpush1.msra.mxu0 %v4359_v55  ;;  %937 = vmatpush1.msra.mxu1 %v4360_v0  ;;  %v2304_v55 = vld [vmem:[%s2873_s27 + $0x50] sm:$0xff] }
 0x14b   : > { %861 = vmatprep.subr.mxu0 %v4361_v56  ;;  %938 = vmatprep.subr.mxu1 %v4362_v3 }
 0x14c   : > { %862 = vmatpush1.msra.mxu0 %v4363_v53  ;;  %939 = vmatpush1.msra.mxu1 %v4364_v1  ;;  %v2307_v53 = vld [vmem:[%s2873_s27 + $0x68] sm:$0xff] }
 0x14d   : > { %863 = vmatprep.subr.mxu0 %v4365_v54  ;;  %940 = vmatprep.subr.mxu1 %v4366_v8 }
 0x14e   : > { %864 = vmatpush1.msra.mxu0 %v4367_v52  ;;  %941 = vmatpush1.msra.mxu1 %v4368_v61  ;;  %v4376_v52 = vld [vmem:[#allocation30_spill] sm:$0xff] }
 0x14f   : > { %865 = vmatprep.subr.mxu0 %v4369_v4  ;;  %942 = vmatprep.subr.mxu1 %v4370_v59  ;;  %v4377_v4 = vld [vmem:[#allocation7_spill] sm:$0xff]  ;;  %v4378_v59 = vld [vmem:[#allocation8_spill] sm:$0xff] }
 0x150   : > { %866 = vmatpush1.msra.mxu0 %v4371_v48  ;;  %943 = vmatpush1.msra.mxu1 %v4372_v50  ;;  %v2302_v48 = vld [vmem:[%s2873_s27 + $0x40] sm:$0xff]  ;;  %v2303_v50 = vld [vmem:[%s2873_s27 + $0x48] sm:$0xff] }
 0x151   : > { %867 = vmatprep.subr.mxu0 %v4373_v57  ;;  %944 = vmatprep.subr.mxu1 %v4374_v62  ;;  %v2306_v62 = vld [vmem:[%s2873_s27 + $0x60] sm:$0xff] }
 0x152   : > { %868 = vmatpush1.msra.mxu0 %v4375_v63  ;;  %901 = vmatprep.mubr.f32.mxu0 %v4351_v60 }
 0x153   : > { %945 = vmatpush1.msra.mxu1 %v4376_v52  ;;  %978 = vmatprep.mubr.f32.mxu1 %v4351_v60 }
 0x154   : > { %1056 = vmatprep.subr.mxu0 %v4377_v4  ;;  %1133 = vmatprep.subr.mxu1 %v4378_v59 }
 0x1f1   : > { %v684_v61 = vpop.f32.mrf.mxu0  ;;  %v761_v52 = vpop.f32.mrf.mxu1 }
 0x1f2   : > { %v772_v57 = vadd.f32 %v2302_v48, %v684_v61  ;;  %v774_v48 = vadd.f32 %v2304_v55, %v761_v52 }
 0x1f3   : > { %v686_v8 = vpop.f32.mrf.mxu0  ;;  %v763_v58 = vpop.f32.mrf.mxu1 }
 0x1f4   : > { %v2310_v54 = vmul.f32 -1.442695, %v772_v57  ;;  %v773_v1 = vadd.f32 %v2303_v50, %v686_v8  ;;  %v2308_v8 = vld [vmem:[%s2873_s27 + $0x70] sm:$0xff]  ;;  %v2305_v57 = vld [vmem:[%s2873_s27 + $0x58] sm:$0xff]  ;;  %v2312_v46 = vmul.f32 -1.442695, %v774_v48 }
 0x1f5   : > { %v690_v63 = vpop.f32.mrf.mxu0  ;;  %v767_v50 = vpop.f32.mrf.mxu1  ;;  %v775_v42 = vadd.f32 %v2305_v57, %v763_v58 }
 0x1f6   : > { %2474 = vpow2.f32 %v2310_v54  ;;  %v2311_v3 = vmul.f32 -1.442695, %v773_v1  ;;  %v776_v56 = vadd.f32 %v2306_v62, %v690_v63  ;;  %v778_v54 = vadd.f32 %v2308_v8, %v767_v50  ;;  %v2309_v62 = vld [vmem:[%s2873_s27 + $0x78] sm:$0xff] }
 0x1f7   : > { %v692_v4 = vpop.f32.mrf.mxu0  ;;  %v769_v63 = vpop.f32.mrf.mxu1 }
 0x1f8   : > { %2476 = vpow2.f32 %v2311_v3  ;;  %v2313_v59 = vmul.f32 -1.442695, %v776_v56  ;;  %v777_v0 = vadd.f32 %v2307_v53, %v692_v4  ;;  %v2315_v56 = vmul.f32 -1.442695, %v778_v54 }
 0x1fa   : > { %2478 = vpow2.f32 %v2313_v59  ;;  %v2314_v61 = vmul.f32 -1.442695, %v777_v0  ;;  %v779_v0 = vadd.f32 %v2309_v62, %v769_v63 }
 0x1fc   : > { %2480 = vpow2.f32 %v2314_v61 }
 0x1fd   : > { %2482 = vpow2.f32 %v2312_v46 }
 0x203   : > { %v2475_v2 = vpop.eup %2474 }
 0x204   : > { %v798_v1 = vadd.f32 1.0, %v2475_v2 }
 0x205   : > { %v2477_v3 = vpop.eup %2476 }
 0x206   : > { %2484 = vrcp.f32 %v798_v1  ;;  %v799_v53 = vadd.f32 1.0, %v2477_v3 }
 0x207   : > { %v2479_v4 = vpop.eup %2478  ;;  %2486 = vtanh.f32 %v775_v42 }
 0x208   : > { %2488 = vrcp.f32 %v799_v53  ;;  %v801_v55 = vadd.f32 1.0, %v2479_v4 }
 0x209   : > { %v2481_v52 = vpop.eup %2480  ;;  %2490 = vpow2.f32 %v2315_v56 }
 0x20a   : > { %2492 = vrcp.f32 %v801_v55  ;;  %v802_v59 = vadd.f32 1.0, %v2481_v52  ;;  %v2483_v58 = vpop.eup %2482 }
 0x20b   : > { %2494 = vtanh.f32 %v779_v0  ;;  %v800_v8 = vadd.f32 1.0, %v2483_v58 }
 0x20c   : > { %2496 = vrcp.f32 %v802_v59 }
 0x20d   : > { %2498 = vrcp.f32 %v800_v8 }
 0x213   : > { %v2485_v2 = vpop.eup %2484 }
 0x214   : > { %v2487_v61 = vpop.eup %2486 }
 0x215   : > { %v2489_v48 = vpop.eup %2488  ;;  %v820_v57 = vmul.f32 %v2487_v61, %v2485_v2 }
 0x216   : > { %v2491_v46 = vpop.eup %2490  ;;  %v818_v50 = vmul.f32 %v2489_v48, %v3352_v44  ;;  %v2322_v48 = vld [vmem:[%s2873_s27 + $0xb0] sm:$0xff] }
 0x217   : > { %v2493_v54 = vpop.eup %2492  ;;  %v803_v63 = vadd.f32 1.0, %v2491_v46  ;;  %v2319_v46 = vld [vmem:[%s2873_s27 + $0x98] sm:$0xff] }
 0x218   : > { %v2495_v42 = vpop.eup %2494  ;;  %v3435_v1 = vadd.f32 %v820_v57, %v818_v50 }
 0x219   : > { %v2497_v62 = vpop.eup %2496  ;;  %v821_v56 = vmul.f32 %v2495_v42, %v2493_v54 }
 0x21a   : > { %2500 = vtanh.f32 %v3435_v1  ;;  %v819_v3 = vmul.f32 %v2497_v62, %v3355_v13  ;;  %v2499_v4 = vpop.eup %2498  ;;  %v2318_v13 = vld [vmem:[%s2873_s27 + $0x90] sm:$0xff] }
 0x21b   : > { %2502 = vrcp.f32 %v803_v63  ;;  %v2323_v63 = vld [vmem:[%s2873_s27 + $0xb8] sm:$0xff] }
 0x21c   : > { %v3439_v53 = vadd.f32 %v821_v56, %v819_v3 }
 0x21e   : > { %2504 = vtanh.f32 %v3439_v53 }
 0x227   : > { %v2501_v44 = vpop.eup %2500 }
 0x228   : > { %v826_v0 = vmul.f32 %v2501_v44, %v2499_v4  ;;  %v2503_v55 = vpop.eup %2502 }
 0x22a   : > { %902 = vmatmul.mubr.f32.vlgmr.msra.gmra.mxu0 %v826_v0  ;;  %979 = vmatmul.mubr.f32.vlgmr.msra.gmra.mxu1 %v826_v0 }
 0x22b   : > { %v2505_v52 = vpop.eup %2504  ;;  %907 = vmatprep.mubr.f32.mxu0 %v4351_v60  ;;  %984 = vmatprep.mubr.f32.mxu1 %v4351_v60 }
 0x22c   : > { %v827_v59 = vmul.f32 %v2505_v52, %v2503_v55  ;;  %1057 = vmatpush1.msra.mxu0 %v2896_v5  ;;  %1134 = vmatpush1.msra.mxu1 %v2950_v15  ;;  %v4379_v5 = vld [vmem:[#allocation9_spill] sm:$0xff] }
 0x22d   : > { %1058 = vmatprep.subr.mxu0 %v2901_v6  ;;  %1135 = vmatprep.subr.mxu1 %v2962_v17  ;;  %v4380_v6 = vld [vmem:[#allocation15_spill] sm:$0xff]  ;;  %v4387_v15 = vld [vmem:[#allocation13_spill] sm:$0xff]  ;;  %v4389_v17 = vld [vmem:[#allocation14_spill] sm:$0xff] }
 0x22e   : > { %908 = vmatmul.mubr.f32.gmra.mxu0 %v827_v59  ;;  %985 = vmatmul.mubr.f32.gmra.mxu1 %v827_v59 }
 0x22f   : > { %1059 = vmatpush1.msra.mxu0 %v2907_v7  ;;  %1136 = vmatpush1.msra.mxu1 %v2967_v18  ;;  %v4381_v7 = vld [vmem:[#allocation10_spill] sm:$0xff]  ;;  %v4390_v18 = vld [vmem:[#allocation25_spill] sm:$0xff] }
 0x230   : > { %1060 = vmatprep.subr.mxu0 %v2914_v9  ;;  %1137 = vmatprep.subr.mxu1 %v2979_v20  ;;  %v4382_v9 = vld [vmem:[#allocation17_spill] sm:$0xff]  ;;  %v4392_v20 = vld [vmem:[#allocation26_spill] sm:$0xff] }
 0x231   : > { %1061 = vmatpush1.msra.mxu0 %v2921_v10  ;;  %1138 = vmatpush1.msra.mxu1 %v2991_v22  ;;  %v4383_v10 = vld [vmem:[#allocation11_spill] sm:$0xff] }
 0x232   : > { %1062 = vmatprep.subr.mxu0 %v2927_v11  ;;  %1139 = vmatprep.subr.mxu1 %v2996_v23  ;;  %v4384_v11 = vld [vmem:[#allocation19_spill] sm:$0xff]  ;;  %v4395_v23 = vld [vmem:[#allocation20_spill] sm:$0xff] }
 0x233   : > { %1063 = vmatpush1.msra.mxu0 %v2933_v12  ;;  %1140 = vmatpush1.msra.mxu1 %v3008_v25  ;;  %v4385_v12 = vld [vmem:[#allocation12_spill] sm:$0xff]  ;;  %v4394_v22 = vld [vmem:[#allocation27_spill] sm:$0xff]  ;;  %v4397_v25 = vld [vmem:[#allocation22_spill] sm:$0xff] }
 0x234   : > { %1064 = vmatprep.subr.mxu0 %v2944_v14  ;;  %1141 = vmatprep.subr.mxu1 %v3020_v27  ;;  %v4386_v14 = vld [vmem:[#allocation21_spill] sm:$0xff]  ;;  %v4399_v27 = vld [vmem:[#allocation24_spill] sm:$0xff] }
 0x235   : > { %1065 = vmatpush1.msra.mxu0 %v2956_v16  ;;  %1142 = vmatpush1.msra.mxu1 %v3032_v29  ;;  %v4388_v16 = vld [vmem:[#allocation23_spill] sm:$0xff] }
 0x236   : > { %1066 = vmatprep.subr.mxu0 %v2973_v19  ;;  %1143 = vmatprep.subr.mxu1 %v3044_v31  ;;  %v4391_v19 = vld [vmem:[#allocation16_spill] sm:$0xff]  ;;  %v4401_v29 = vld [vmem:[#allocation7_spill] sm:$0xff]  ;;  %v2316_v31 = vld [vmem:[%s2873_s27 + $0x80] sm:$0xff] }
 0x237   : > { %1067 = vmatpush1.msra.mxu0 %v2985_v21  ;;  %1144 = vmatpush1.msra.mxu1 %v3056_v33  ;;  %v4393_v21 = vld [vmem:[#allocation18_spill] sm:$0xff] }
 0x238   : > { %1068 = vmatprep.subr.mxu0 %v3002_v24  ;;  %1145 = vmatprep.subr.mxu1 %v3068_v35  ;;  %v4396_v24 = vld [vmem:[#allocation28_spill] sm:$0xff]  ;;  %v2317_v33 = vld [vmem:[%s2873_s27 + $0x88] sm:$0xff] }
 0x239   : > { %1069 = vmatpush1.msra.mxu0 %v3014_v26  ;;  %1146 = vmatpush1.msra.mxu1 %v3080_v37  ;;  %v4398_v26 = vld [vmem:[#allocation29_spill] sm:$0xff] }
 0x23a   : > { %1070 = vmatprep.subr.mxu0 %v3026_v28  ;;  %1147 = vmatprep.subr.mxu1 %v3092_v39  ;;  %v4400_v28 = vld [vmem:[#allocation30_spill] sm:$0xff] }
 0x23b   : > { %1071 = vmatpush1.msra.mxu0 %v3038_v30  ;;  %1148 = vmatpush1.msra.mxu1 %v3104_v41  ;;  %v4402_v30 = vld [vmem:[#allocation8_spill] sm:$0xff] }
 0x23c   : > { %1072 = vmatprep.subr.mxu0 %v3050_v32  ;;  %1149 = vmatprep.subr.mxu1 %v3116_v43 }
 0x23d   : > { %1073 = vmatpush1.msra.mxu0 %v3062_v34  ;;  %1150 = vmatpush1.msra.mxu1 %v3128_v45 }
 0x23e   : > { %1074 = vmatprep.subr.mxu0 %v3074_v36  ;;  %1151 = vmatprep.subr.mxu1 %v3140_v47  ;;  %v2320_v36 = vld [vmem:[%s2873_s27 + $0xa0] sm:$0xff] }
 0x23f   : > { %1075 = vmatpush1.msra.mxu0 %v3086_v38  ;;  %1152 = vmatpush1.msra.mxu1 %v3152_v49 }
 0x240   : > { %1076 = vmatprep.subr.mxu0 %v3098_v40  ;;  %1153 = vmatprep.subr.mxu1 %v3164_v51  ;;  %v2321_v40 = vld [vmem:[%s2873_s27 + $0xa8] sm:$0xff] }
 0x241   : > { %1077 = vmatpush1.msra.mxu0 %v4379_v5  ;;  %1154 = vmatpush1.msra.mxu1 %v4380_v6 }
 0x242   : > { %1078 = vmatprep.subr.mxu0 %v4381_v7  ;;  %1155 = vmatprep.subr.mxu1 %v4382_v9 }
 0x243   : > { %1079 = vmatpush1.msra.mxu0 %v4383_v10  ;;  %1156 = vmatpush1.msra.mxu1 %v4384_v11 }
 0x244   : > { %1080 = vmatprep.subr.mxu0 %v4385_v12  ;;  %1157 = vmatprep.subr.mxu1 %v4386_v14 }
 0x245   : > { %1081 = vmatpush1.msra.mxu0 %v4387_v15  ;;  %1158 = vmatpush1.msra.mxu1 %v4388_v16 }
 0x246   : > { %1082 = vmatprep.subr.mxu0 %v4389_v17  ;;  %1159 = vmatprep.subr.mxu1 %v4390_v18 }
 0x247   : > { %1083 = vmatpush1.msra.mxu0 %v4391_v19  ;;  %1160 = vmatpush1.msra.mxu1 %v4392_v20 }
 0x248   : > { %1084 = vmatprep.subr.mxu0 %v4393_v21  ;;  %1161 = vmatprep.subr.mxu1 %v4394_v22 }
 0x249   : > { %1085 = vmatpush1.msra.mxu0 %v4395_v23  ;;  %1162 = vmatpush1.msra.mxu1 %v4396_v24 }
 0x24a   : > { %1086 = vmatprep.subr.mxu0 %v4397_v25  ;;  %1163 = vmatprep.subr.mxu1 %v4398_v26 }
 0x24b   : > { %1087 = vmatpush1.msra.mxu0 %v4399_v27  ;;  %1120 = vmatprep.mubr.f32.mxu0 %v4351_v60 }
 0x24c   : > { %1164 = vmatpush1.msra.mxu1 %v4400_v28  ;;  %1197 = vmatprep.mubr.f32.mxu1 %v4351_v60 }
 0x24d   : > { %1275 = vmatprep.subr.mxu0 %v4401_v29  ;;  %1352 = vmatprep.subr.mxu1 %v4402_v30  ;;  %v3537_v29 = vld [vmem:[%s4226_s1 + $0x1f0] sm:$0xff]  ;;  %v3543_v30 = vld [vmem:[%s4226_s1 + $0x1c8] sm:$0xff] }
 0x2ea   : > { %v903_v32 = vpop.f32.mrf.mxu0  ;;  %v980_v41 = vpop.f32.mrf.mxu1 }
 0x2eb   : > { %v991_v34 = vadd.f32 %v2316_v31, %v903_v32  ;;  %v993_v61 = vadd.f32 %v2318_v13, %v980_v41  ;;  %v3549_v31 = vld [vmem:[%s4226_s1 + $0x1d8] sm:$0xff]  ;;  %v3555_v32 = vld [vmem:[%s4226_s1 + $0x1c0] sm:$0xff]  ;;  %v3609_v41 = vld [vmem:[%s4226_s1 + $0x190] sm:$0xff] }
 0x2ec   : > { %v905_v35 = vpop.f32.mrf.mxu0  ;;  %v982_v58 = vpop.f32.mrf.mxu1  ;;  %v3645_v13 = vld [vmem:[%s4226_s1 + $0x158] sm:$0xff] }
 0x2ed   : > { %v2324_v37 = vmul.f32 -1.442695, %v991_v34  ;;  %v992_v38 = vadd.f32 %v2317_v33, %v905_v35  ;;  %v2326_v50 = vmul.f32 -1.442695, %v993_v61  ;;  %v994_v42 = vadd.f32 %v2319_v46, %v982_v58  ;;  %v3561_v33 = vld [vmem:[%s4226_s1 + $0x1d0] sm:$0xff]  ;;  %v3567_v34 = vld [vmem:[%s4226_s1 + $0x1a8] sm:$0xff] }
 0x2ee   : > { %v909_v39 = vpop.f32.mrf.mxu0  ;;  %v986_v8 = vpop.f32.mrf.mxu1  ;;  %v3573_v35 = vld [vmem:[%s4226_s1 + $0x1b8] sm:$0xff]  ;;  %v3651_v58 = vld [vmem:[%s4226_s1 + $0x140] sm:$0xff]  ;;  %v3663_v61 = vld [vmem:[%s4226_s1 + $0x128] sm:$0xff] }
 0x2ef   : > { %2506 = vpow2.f32 %v2324_v37  ;;  %v2325_v43 = vmul.f32 -1.442695, %v992_v38  ;;  %v995_v45 = vadd.f32 %v2320_v36, %v909_v39  ;;  %v997_v57 = vadd.f32 %v2322_v48, %v986_v8  ;;  %v3579_v36 = vld [vmem:[%s4226_s1 + $0x1a0] sm:$0xff]  ;;  %v3585_v37 = vld [vmem:[%s4226_s1 + $0x1b0] sm:$0xff]  ;;  %v3591_v38 = vld [vmem:[%s4226_s1 + $0x188] sm:$0xff] }
 0x2f0   : > { %v911_v47 = vpop.f32.mrf.mxu0  ;;  %v988_v3 = vpop.f32.mrf.mxu1  ;;  %v3597_v39 = vld [vmem:[%s4226_s1 + $0x198] sm:$0xff]  ;;  %v3675_v8 = vld [vmem:[%s4226_s1 + $0x120] sm:$0xff]  ;;  %v3681_v46 = vld [vmem:[%s4226_s1 + $0x130] sm:$0xff] }
 0x2f1   : > { %2508 = vpow2.f32 %v2325_v43  ;;  %v2327_v49 = vmul.f32 -1.442695, %v995_v45  ;;  %v996_v51 = vadd.f32 %v2321_v40, %v911_v47  ;;  %v2329_v4 = vmul.f32 -1.442695, %v997_v57  ;;  %v3603_v40 = vld [vmem:[%s4226_s1 + $0x180] sm:$0xff]  ;;  %v3615_v43 = vld [vmem:[%s4226_s1 + $0x168] sm:$0xff] }
 0x2f2   : > { %v998_v55 = vadd.f32 %v2323_v63, %v988_v3  ;;  %v3621_v45 = vld [vmem:[%s4226_s1 + $0x178] sm:$0xff]  ;;  %v3627_v47 = vld [vmem:[%s4226_s1 + $0x160] sm:$0xff] }
 0x2f3   : > { %2510 = vpow2.f32 %v2327_v49  ;;  %v2328_v2 = vmul.f32 -1.442695, %v996_v51  ;;  %v3633_v49 = vld [vmem:[%s4226_s1 + $0x170] sm:$0xff]  ;;  %v3639_v51 = vld [vmem:[%s4226_s1 + $0x148] sm:$0xff]  ;;  %v3669_v48 = vld [vmem:[%s4226_s1 + $0x138] sm:$0xff] }
 0x2f4   : > { %v3693_v57 = vld [vmem:[%s4226_s1 + $0x118] sm:$0xff]  ;;  %v3723_v3 = vld [vmem:[%s4226_s1 + $0xe0] sm:$0xff] }
 0x2f5   : > { %2512 = vpow2.f32 %v2328_v2  ;;  %v3657_v2 = vld [vmem:[%s4226_s1 + $0x150] sm:$0xff]  ;;  %v3717_v63 = vld [vmem:[%s4226_s1 + $0xf8] sm:$0xff] }
 0x2f6   : > { %2514 = vpow2.f32 %v2326_v50  ;;  %v3687_v50 = vld [vmem:[%s4226_s1 + $0x108] sm:$0xff] }
 0x2fc   : > { %v2507_v54 = vpop.eup %2506 }
 0x2fd   : > { %v1017_v62 = vadd.f32 1.0, %v2507_v54  ;;  %v3699_v54 = vld [vmem:[%s4226_s1 + $0x100] sm:$0xff] }
 0x2fe   : > { %v2509_v56 = vpop.eup %2508 }
 0x2ff   : > { %2516 = vrcp.f32 %v1017_v62  ;;  %v1018_v44 = vadd.f32 1.0, %v2509_v56  ;;  %v3711_v62 = vld [vmem:[%s4226_s1 + $0xe8] sm:$0xff]  ;;  %v3729_v56 = vld [vmem:[%s4226_s1 + $0xf0] sm:$0xff] }
 0x300   : > { %v2511_v0 = vpop.eup %2510  ;;  %2518 = vtanh.f32 %v994_v42  ;;  %v3705_v42 = vld [vmem:[%s4226_s1 + $0x110] sm:$0xff] }
 0x301   : > { %2520 = vrcp.f32 %v1018_v44  ;;  %v1020_v52 = vadd.f32 1.0, %v2511_v0  ;;  %v3741_v44 = vld [vmem:[%s4226_s1 + $0xd8] sm:$0xff]  ;;  %v3747_v0 = vld [vmem:[%s4226_s1 + $0xc0] sm:$0xff] }
 0x302   : > { %v2513_v59 = vpop.eup %2512  ;;  %2522 = vpow2.f32 %v2329_v4  ;;  %v3735_v4 = vld [vmem:[%s4226_s1 + $0xc8] sm:$0xff] }
 0x303   : > { %2524 = vrcp.f32 %v1020_v52  ;;  %v1021_v5 = vadd.f32 1.0, %v2513_v59  ;;  %v2515_v6 = vpop.eup %2514  ;;  %v3759_v52 = vld [vmem:[%s4226_s1 + $0xa8] sm:$0xff]  ;;  %v3765_v59 = vld [vmem:[%s4226_s1 + $0xb8] sm:$0xff] }
 0x304   : > { %2526 = vtanh.f32 %v998_v55  ;;  %v1019_v11 = vadd.f32 1.0, %v2515_v6  ;;  %v3753_v55 = vld [vmem:[%s4226_s1 + $0xd0] sm:$0xff] }
 0x305   : > { %2528 = vrcp.f32 %v1021_v5  ;;  %v3771_v5 = vld [vmem:[%s4226_s1 + $0xa0] sm:$0xff]  ;;  %v3777_v6 = vld [vmem:[%s4226_s1 + $0xb0] sm:$0xff] }
 0x306   : > { %2530 = vrcp.f32 %v1019_v11  ;;  %4403 = vst [vmem:[#allocation9_spill] sm:$0xff] %v3771_v5  ;;  %4404 = vst [vmem:[#allocation15_spill] sm:$0xff] %v3777_v6  ;;  %v3801_v11 = vld [vmem:[%s4226_s1 + $0x90] sm:$0xff] }
 0x307   : > { %4408 = vst [vmem:[#allocation19_spill] sm:$0xff] %v3801_v11 }
 0x30c   : > { %v2517_v7 = vpop.eup %2516 }
 0x30d   : > { %v2519_v9 = vpop.eup %2518 }
 0x30e   : > { %v2521_v10 = vpop.eup %2520  ;;  %v1039_v15 = vmul.f32 %v2519_v9, %v2517_v7  ;;  %v3783_v7 = vld [vmem:[%s4226_s1 + $0x88] sm:$0xff]  ;;  %v3789_v9 = vld [vmem:[%s4226_s1 + $0x98] sm:$0xff] }
 0x30f   : > { %v2523_v12 = vpop.eup %2522  ;;  %v1037_v14 = vmul.f32 %v2521_v10, %v3435_v1  ;;  %4405 = vst [vmem:[#allocation10_spill] sm:$0xff] %v3783_v7  ;;  %4406 = vst [vmem:[#allocation17_spill] sm:$0xff] %v3789_v9  ;;  %v3795_v10 = vld [vmem:[%s4226_s1 + $0x80] sm:$0xff] }
 0x310   : > { %v2525_v16 = vpop.eup %2524  ;;  %v1022_v20 = vadd.f32 1.0, %v2523_v12  ;;  %4407 = vst [vmem:[#allocation11_spill] sm:$0xff] %v3795_v10  ;;  %v3807_v12 = vld [vmem:[%s4226_s1 + $0x68] sm:$0xff] }
 0x311   : > { %v2527_v17 = vpop.eup %2526  ;;  %v3519_v18 = vadd.f32 %v1039_v15, %v1037_v14  ;;  %4409 = vst [vmem:[#allocation12_spill] sm:$0xff] %v3807_v12  ;;  %v3813_v14 = vld [vmem:[%s4226_s1 + $0x78] sm:$0xff]  ;;  %v3819_v15 = vld [vmem:[%s4226_s1 + $0x60] sm:$0xff] }
 0x312   : > { %v2529_v19 = vpop.eup %2528  ;;  %v1040_v22 = vmul.f32 %v2527_v17, %v2525_v16  ;;  %4410 = vst [vmem:[#allocation21_spill] sm:$0xff] %v3813_v14  ;;  %4411 = vst [vmem:[#allocation13_spill] sm:$0xff] %v3819_v15  ;;  %v3825_v16 = vld [vmem:[%s4226_s1 + $0x70] sm:$0xff]  ;;  %v3831_v17 = vld [vmem:[%s4226_s1 + $0x48] sm:$0xff] }
 0x313   : > { %2532 = vtanh.f32 %v3519_v18  ;;  %v1038_v21 = vmul.f32 %v2529_v19, %v3439_v53  ;;  %v2531_v24 = vpop.eup %2530  ;;  %v3531_v53 = vld [vmem:[%s4226_s1 + $0x1e0] sm:$0xff]  ;;  %4412 = vst [vmem:[#allocation23_spill] sm:$0xff] %v3825_v16  ;;  %4413 = vst [vmem:[#allocation14_spill] sm:$0xff] %v3831_v17  ;;  %v3837_v19 = vld [vmem:[%s4226_s1 + $0x58] sm:$0xff] }
 0x314   : > { %2534 = vrcp.f32 %v1022_v20  ;;  %4414 = vst [vmem:[#allocation25_spill] sm:$0xff] %v3837_v19  ;;  %v3843_v20 = vld [vmem:[%s4226_s1 + $0x40] sm:$0xff] }
 0x315   : > { %v3523_v23 = vadd.f32 %v1040_v22, %v1038_v21  ;;  %4415 = vst [vmem:[#allocation16_spill] sm:$0xff] %v3843_v20  ;;  %v3849_v21 = vld [vmem:[%s4226_s1 + $0x50] sm:$0xff]  ;;  %v3855_v22 = vld [vmem:[%s4226_s1 + $0x28] sm:$0xff] }
 0x316   : > { %4416 = vst [vmem:[#allocation26_spill] sm:$0xff] %v3849_v21  ;;  %4417 = vst [vmem:[#allocation18_spill] sm:$0xff] %v3855_v22 }
 0x317   : > { %2536 = vtanh.f32 %v3523_v23 }
 0x320   : > { %v2533_v1 = vpop.eup %2532 }
 0x321   : > { %v1045_v25 = vmul.f32 %v2533_v1, %v2531_v24  ;;  %v2535_v26 = vpop.eup %2534  ;;  %v3861_v24 = vld [vmem:[%s4226_s1 + $0x38] sm:$0xff]  ;;  %v3867_v1 = vld [vmem:[%s4226_s1 + $0x20] sm:$0xff] }
 0x322   : > { %4418 = vst [vmem:[#allocation27_spill] sm:$0xff] %v3861_v24  ;;  %4419 = vst [vmem:[#allocation20_spill] sm:$0xff] %v3867_v1 }
 0x323   : > { %1121 = vmatmul.mubr.f32.vlgmr.msra.gmra.mxu0 %v1045_v25  ;;  %1198 = vmatmul.mubr.f32.vlgmr.msra.gmra.mxu1 %v1045_v25  ;;  %v3873_v25 = vld [vmem:[%s4226_s1 + $0x30] sm:$0xff] }
 0x324   : > { %v2537_v27 = vpop.eup %2536  ;;  %1126 = vmatprep.mubr.f32.mxu0 %v4351_v60  ;;  %1203 = vmatprep.mubr.f32.mxu1 %v4351_v60  ;;  %4420 = vst [vmem:[#allocation28_spill] sm:$0xff] %v3873_v25 }
 0x325   : > { %v1046_v28 = vmul.f32 %v2537_v27, %v2535_v26  ;;  %1276 = vmatpush1.msra.mxu0 %v3531_v53  ;;  %1353 = vmatpush1.msra.mxu1 %v3537_v29  ;;  %v3879_v26 = vld [vmem:[%s4226_s1 + $0x8] sm:$0xff]  ;;  %v3885_v27 = vld [vmem:[%s4226_s1 + $0x18] sm:$0xff] }
 0x326   : > { %1277 = vmatprep.subr.mxu0 %v3543_v30  ;;  %1354 = vmatprep.subr.mxu1 %v3549_v31  ;;  %4421 = vst [vmem:[#allocation22_spill] sm:$0xff] %v3879_v26  ;;  %4422 = vst [vmem:[#allocation29_spill] sm:$0xff] %v3885_v27 }
 0x327   : > { %1127 = vmatmul.mubr.f32.gmra.mxu0 %v1046_v28  ;;  %1204 = vmatmul.mubr.f32.gmra.mxu1 %v1046_v28  ;;  %v3891_v28 = vld [vmem:[%s4226_s1] sm:$0xff] }
 0x328   : > { %1278 = vmatpush1.msra.mxu0 %v3555_v32  ;;  %1355 = vmatpush1.msra.mxu1 %v3561_v33  ;;  %4423 = vst [vmem:[#allocation24_spill] sm:$0xff] %v3891_v28 }
 0x329   : > { %1279 = vmatprep.subr.mxu0 %v3567_v34  ;;  %1356 = vmatprep.subr.mxu1 %v3573_v35 }
 0x32a   : > { %1280 = vmatpush1.msra.mxu0 %v3579_v36  ;;  %1357 = vmatpush1.msra.mxu1 %v3585_v37 }
 0x32b   : > { %1281 = vmatprep.subr.mxu0 %v3591_v38  ;;  %1358 = vmatprep.subr.mxu1 %v3597_v39 }
 0x32c   : > { %1282 = vmatpush1.msra.mxu0 %v3603_v40  ;;  %1359 = vmatpush1.msra.mxu1 %v3609_v41 }
 0x32d   : > { %1283 = vmatprep.subr.mxu0 %v3615_v43  ;;  %1360 = vmatprep.subr.mxu1 %v3621_v45 }
 0x32e   : > { %1284 = vmatpush1.msra.mxu0 %v3627_v47  ;;  %1361 = vmatpush1.msra.mxu1 %v3633_v49 }
 0x32f   : > { %1285 = vmatprep.subr.mxu0 %v3639_v51  ;;  %1362 = vmatprep.subr.mxu1 %v3645_v13 }
 0x330   : > { %1286 = vmatpush1.msra.mxu0 %v3651_v58  ;;  %1363 = vmatpush1.msra.mxu1 %v3657_v2 }
 0x331   : > { %1287 = vmatprep.subr.mxu0 %v3663_v61  ;;  %1364 = vmatprep.subr.mxu1 %v3669_v48 }
 0x332   : > { %1288 = vmatpush1.msra.mxu0 %v3675_v8  ;;  %1365 = vmatpush1.msra.mxu1 %v3681_v46 }
 0x333   : > { %1289 = vmatprep.subr.mxu0 %v3687_v50  ;;  %1366 = vmatprep.subr.mxu1 %v3693_v57 }
 0x334   : > { %1290 = vmatpush1.msra.mxu0 %v3699_v54  ;;  %1367 = vmatpush1.msra.mxu1 %v3705_v42 }
 0x335   : > { %1291 = vmatprep.subr.mxu0 %v3711_v62  ;;  %1368 = vmatprep.subr.mxu1 %v3717_v63 }
 0x336   : > { %1292 = vmatpush1.msra.mxu0 %v3723_v3  ;;  %1369 = vmatpush1.msra.mxu1 %v3729_v56 }
 0x337   : > { %1293 = vmatprep.subr.mxu0 %v3735_v4  ;;  %1370 = vmatprep.subr.mxu1 %v3741_v44 }
 0x338   : > { %1294 = vmatpush1.msra.mxu0 %v3747_v0  ;;  %1371 = vmatpush1.msra.mxu1 %v3753_v55 }
 0x339   : > { %1295 = vmatprep.subr.mxu0 %v3759_v52  ;;  %1372 = vmatprep.subr.mxu1 %v3765_v59 }
 0x33a   : > { %1296 = vmatpush1.msra.mxu0 %v3771_v5  ;;  %1373 = vmatpush1.msra.mxu1 %v3777_v6 }
 0x33b   : > { %1297 = vmatprep.subr.mxu0 %v3783_v7  ;;  %1374 = vmatprep.subr.mxu1 %v3789_v9 }
 0x33c   : > { %1298 = vmatpush1.msra.mxu0 %v3795_v10  ;;  %1375 = vmatpush1.msra.mxu1 %v3801_v11  ;;  %v2332_v10 = vld [vmem:[%s2873_s27 + $0xd0] sm:$0xff] }
 0x33d   : > { %1299 = vmatprep.subr.mxu0 %v3807_v12  ;;  %1376 = vmatprep.subr.mxu1 %v3813_v14 }
 0x33e   : > { %1300 = vmatpush1.msra.mxu0 %v3819_v15  ;;  %1377 = vmatpush1.msra.mxu1 %v3825_v16  ;;  %v2335_v16 = vld [vmem:[%s2873_s27 + $0xe8] sm:$0xff] }
 0x33f   : > { %1301 = vmatprep.subr.mxu0 %v3831_v17  ;;  %1378 = vmatprep.subr.mxu1 %v3837_v19 }
 0x340   : > { %1302 = vmatpush1.msra.mxu0 %v3843_v20  ;;  %1379 = vmatpush1.msra.mxu1 %v3849_v21  ;;  %v2334_v21 = vld [vmem:[%s2873_s27 + $0xe0] sm:$0xff] }
 0x341   : > { %1303 = vmatprep.subr.mxu0 %v3855_v22  ;;  %1380 = vmatprep.subr.mxu1 %v3861_v24  ;;  %v2331_v24 = vld [vmem:[%s2873_s27 + $0xc8] sm:$0xff] }
 0x342   : > { %1304 = vmatpush1.msra.mxu0 %v3867_v1  ;;  %1381 = vmatpush1.msra.mxu1 %v3873_v25  ;;  %v2330_v25 = vld [vmem:[%s2873_s27 + $0xc0] sm:$0xff] }
 0x343   : > { %1305 = vmatprep.subr.mxu0 %v3879_v26  ;;  %1382 = vmatprep.subr.mxu1 %v3885_v27  ;;  %v3898_v26 = vld [vmem:[%s4226_s1 + $0x10] sm:$0xff]  ;;  %v3905_v27 = vld [vmem:[%s4226_s1 + $0x1e8] sm:$0xff] }
 0x344   : > { %1306 = vmatpush1.msra.mxu0 %v3891_v28  ;;  %1339 = vmatprep.mubr.f32.mxu0 %v4351_v60  ;;  %4424 = vst [vmem:[#allocation30_spill] sm:$0xff] %v3898_v26  ;;  %4425 = vst [vmem:[#allocation7_spill] sm:$0xff] %v3905_v27  ;;  %v3911_v28 = vld [vmem:[%s4226_s1 + $0x1f8] sm:$0xff] }
 0x345   : > { %1383 = vmatpush1.msra.mxu1 %v3898_v26  ;;  %1416 = vmatprep.mubr.f32.mxu1 %v4351_v60  ;;  %4426 = vst [vmem:[#allocation8_spill] sm:$0xff] %v3911_v28 }
 0x346   : > { %1494 = vmatprep.subr.mxu0 %v3905_v27  ;;  %1571 = vmatprep.subr.mxu1 %v3911_v28 }
 0x3e3   : > { %v1122_v1 = vpop.f32.mrf.mxu0  ;;  %v1199_v27 = vpop.f32.mrf.mxu1 }
 0x3e4   : > { %v1210_v26 = vadd.f32 %v2330_v25, %v1122_v1  ;;  %v1212_v25 = vadd.f32 %v2332_v10, %v1199_v27 }
 0x3e5   : > { %v1124_v22 = vpop.f32.mrf.mxu0  ;;  %v1201_v9 = vpop.f32.mrf.mxu1 }
 0x3e6   : > { %v2338_v20 = vmul.f32 -1.442695, %v1210_v26  ;;  %v1211_v19 = vadd.f32 %v2331_v24, %v1124_v22  ;;  %v2336_v22 = vld [vmem:[%s2873_s27 + $0xf0] sm:$0xff]  ;;  %v2333_v26 = vld [vmem:[%s2873_s27 + $0xd8] sm:$0xff]  ;;  %v2340_v7 = vmul.f32 -1.442695, %v1212_v25 }
 0x3e7   : > { %v1128_v17 = vpop.f32.mrf.mxu0  ;;  %v1205_v24 = vpop.f32.mrf.mxu1  ;;  %v1213_v5 = vadd.f32 %v2333_v26, %v1201_v9 }
 0x3e8   : > { %2538 = vpow2.f32 %v2338_v20  ;;  %v2339_v15 = vmul.f32 -1.442695, %v1211_v19  ;;  %v1214_v14 = vadd.f32 %v2334_v21, %v1128_v17  ;;  %v1216_v20 = vadd.f32 %v2336_v22, %v1205_v24  ;;  %v2337_v17 = vld [vmem:[%s2873_s27 + $0xf8] sm:$0xff] }
 0x3e9   : > { %v1130_v12 = vpop.f32.mrf.mxu0  ;;  %v1207_v21 = vpop.f32.mrf.mxu1 }
 0x3ea   : > { %2540 = vpow2.f32 %v2339_v15  ;;  %v2341_v28 = vmul.f32 -1.442695, %v1214_v14  ;;  %v1215_v11 = vadd.f32 %v2335_v16, %v1130_v12  ;;  %v2343_v14 = vmul.f32 -1.442695, %v1216_v20 }
 0x3ec   : > { %2542 = vpow2.f32 %v2341_v28  ;;  %v2342_v1 = vmul.f32 -1.442695, %v1215_v11  ;;  %v1217_v11 = vadd.f32 %v2337_v17, %v1207_v21 }
 0x3ee   : > { %2544 = vpow2.f32 %v2342_v1 }
 0x3ef   : > { %2546 = vpow2.f32 %v2340_v7 }
 0x3f5   : > { %v2539_v6 = vpop.eup %2538 }
 0x3f6   : > { %v1236_v19 = vadd.f32 1.0, %v2539_v6 }
 0x3f7   : > { %v2541_v15 = vpop.eup %2540 }
 0x3f8   : > { %2548 = vrcp.f32 %v1236_v19  ;;  %v1237_v12 = vadd.f32 1.0, %v2541_v15 }
 0x3f9   : > { %v2543_v16 = vpop.eup %2542  ;;  %2550 = vtanh.f32 %v1213_v5 }
 0x3fa   : > { %2552 = vrcp.f32 %v1237_v12  ;;  %v1239_v10 = vadd.f32 1.0, %v2543_v16 }
 0x3fb   : > { %v2545_v27 = vpop.eup %2544  ;;  %2554 = vpow2.f32 %v2343_v14 }
 0x3fc   : > { %2556 = vrcp.f32 %v1239_v10  ;;  %v1240_v28 = vadd.f32 1.0, %v2545_v27  ;;  %v2547_v9 = vpop.eup %2546 }
 0x3fd   : > { %2558 = vtanh.f32 %v1217_v11  ;;  %v1238_v22 = vadd.f32 1.0, %v2547_v9  ;;  %v4428_v9 = vld [vmem:[#allocation15_spill] sm:$0xff] }
 0x3fe   : > { %2560 = vrcp.f32 %v1240_v28 }
 0x3ff   : > { %2562 = vrcp.f32 %v1238_v22  ;;  %v4432_v22 = vld [vmem:[#allocation19_spill] sm:$0xff] }
 0x405   : > { %v2549_v6 = vpop.eup %2548 }
 0x406   : > { %v2551_v1 = vpop.eup %2550 }
 0x407   : > { %v2553_v25 = vpop.eup %2552  ;;  %v1258_v26 = vmul.f32 %v2551_v1, %v2549_v6  ;;  %v4429_v6 = vld [vmem:[#allocation10_spill] sm:$0xff]  ;;  %v4430_v1 = vld [vmem:[#allocation17_spill] sm:$0xff] }
 0x408   : > { %v2555_v7 = vpop.eup %2554  ;;  %v1256_v24 = vmul.f32 %v2553_v25, %v3519_v18  ;;  %v4431_v25 = vld [vmem:[#allocation11_spill] sm:$0xff] }
 0x409   : > { %v2557_v20 = vpop.eup %2556  ;;  %v1241_v21 = vadd.f32 1.0, %v2555_v7  ;;  %v4433_v7 = vld [vmem:[#allocation12_spill] sm:$0xff] }
 0x40a   : > { %v2559_v5 = vpop.eup %2558  ;;  %v3923_v19 = vadd.f32 %v1258_v26, %v1256_v24  ;;  %v4434_v24 = vld [vmem:[#allocation21_spill] sm:$0xff] }
 0x40b   : > { %v2561_v17 = vpop.eup %2560  ;;  %v1259_v14 = vmul.f32 %v2559_v5, %v2557_v20  ;;  %v4435_v26 = vld [vmem:[#allocation13_spill] sm:$0xff]  ;;  %v4436_v20 = vld [vmem:[#allocation23_spill] sm:$0xff]  ;;  %v4437_v5 = vld [vmem:[#allocation14_spill] sm:$0xff] }
 0x40c   : > { %2564 = vtanh.f32 %v3923_v19  ;;  %v1257_v15 = vmul.f32 %v2561_v17, %v3523_v23  ;;  %v2563_v16 = vpop.eup %2562  ;;  %v4427_v23 = vld [vmem:[#allocation9_spill] sm:$0xff] }
 0x40d   : > { %2566 = vrcp.f32 %v1241_v21  ;;  %v4438_v17 = vld [vmem:[#allocation25_spill] sm:$0xff]  ;;  %v4439_v21 = vld [vmem:[#allocation16_spill] sm:$0xff] }
 0x40e   : > { %v3927_v12 = vadd.f32 %v1259_v14, %v1257_v15  ;;  %v4440_v15 = vld [vmem:[#allocation26_spill] sm:$0xff] }
 0x40f   : > { %v4441_v14 = vld [vmem:[#allocation18_spill] sm:$0xff] }
 0x410   : > { %2568 = vtanh.f32 %v3927_v12 }
 0x419   : > { %v2565_v18 = vpop.eup %2564 }
 0x41a   : > { %v1264_v11 = vmul.f32 %v2565_v18, %v2563_v16  ;;  %v2567_v10 = vpop.eup %2566  ;;  %v4442_v16 = vld [vmem:[#allocation27_spill] sm:$0xff]  ;;  %v4443_v18 = vld [vmem:[#allocation20_spill] sm:$0xff] }
 0x41c   : > { %1340 = vmatmul.mubr.f32.vlgmr.msra.gmra.mxu0 %v1264_v11  ;;  %1417 = vmatmul.mubr.f32.vlgmr.msra.gmra.mxu1 %v1264_v11  ;;  %v4444_v11 = vld [vmem:[#allocation28_spill] sm:$0xff] }
 0x41d   : > { %v2569_v27 = vpop.eup %2568  ;;  %1345 = vmatprep.mubr.f32.mxu0 %v4351_v60  ;;  %1422 = vmatprep.mubr.f32.mxu1 %v4351_v60 }
 0x41e   : > { %v1265_v28 = vmul.f32 %v2569_v27, %v2567_v10  ;;  %1495 = vmatpush1.msra.mxu0 %v3531_v53  ;;  %1572 = vmatpush1.msra.mxu1 %v3537_v29  ;;  %v4445_v10 = vld [vmem:[#allocation22_spill] sm:$0xff]  ;;  %v4446_v27 = vld [vmem:[#allocation29_spill] sm:$0xff] }
 0x41f   : > { %1496 = vmatprep.subr.mxu0 %v3543_v30  ;;  %1573 = vmatprep.subr.mxu1 %v3549_v31 }
 0x420   : > { %1346 = vmatmul.mubr.f32.gmra.mxu0 %v1265_v28  ;;  %1423 = vmatmul.mubr.f32.gmra.mxu1 %v1265_v28  ;;  %v4447_v28 = vld [vmem:[#allocation24_spill] sm:$0xff] }
 0x421   : > { %1497 = vmatpush1.msra.mxu0 %v3555_v32  ;;  %1574 = vmatpush1.msra.mxu1 %v3561_v33 }
 0x422   : > { %1498 = vmatprep.subr.mxu0 %v3567_v34  ;;  %1575 = vmatprep.subr.mxu1 %v3573_v35 }
 0x423   : > { %1499 = vmatpush1.msra.mxu0 %v3579_v36  ;;  %1576 = vmatpush1.msra.mxu1 %v3585_v37 }
 0x424   : > { %1500 = vmatprep.subr.mxu0 %v3591_v38  ;;  %1577 = vmatprep.subr.mxu1 %v3597_v39 }
 0x425   : > { %1501 = vmatpush1.msra.mxu0 %v3603_v40  ;;  %1578 = vmatpush1.msra.mxu1 %v3609_v41 }
 0x426   : > { %1502 = vmatprep.subr.mxu0 %v3615_v43  ;;  %1579 = vmatprep.subr.mxu1 %v3621_v45 }
 0x427   : > { %1503 = vmatpush1.msra.mxu0 %v3627_v47  ;;  %1580 = vmatpush1.msra.mxu1 %v3633_v49 }
 0x428   : > { %1504 = vmatprep.subr.mxu0 %v3639_v51  ;;  %1581 = vmatprep.subr.mxu1 %v3645_v13 }
 0x429   : > { %1505 = vmatpush1.msra.mxu0 %v3651_v58  ;;  %1582 = vmatpush1.msra.mxu1 %v3657_v2 }
 0x42a   : > { %1506 = vmatprep.subr.mxu0 %v3663_v61  ;;  %1583 = vmatprep.subr.mxu1 %v3669_v48 }
 0x42b   : > { %1507 = vmatpush1.msra.mxu0 %v3675_v8  ;;  %1584 = vmatpush1.msra.mxu1 %v3681_v46 }
 0x42c   : > { %1508 = vmatprep.subr.mxu0 %v3687_v50  ;;  %1585 = vmatprep.subr.mxu1 %v3693_v57 }
 0x42d   : > { %1509 = vmatpush1.msra.mxu0 %v3699_v54  ;;  %1586 = vmatpush1.msra.mxu1 %v3705_v42 }
 0x42e   : > { %1510 = vmatprep.subr.mxu0 %v3711_v62  ;;  %1587 = vmatprep.subr.mxu1 %v3717_v63 }
 0x42f   : > { %1511 = vmatpush1.msra.mxu0 %v3723_v3  ;;  %1588 = vmatpush1.msra.mxu1 %v3729_v56 }
 0x430   : > { %1512 = vmatprep.subr.mxu0 %v3735_v4  ;;  %1589 = vmatprep.subr.mxu1 %v3741_v44 }
 0x431   : > { %1513 = vmatpush1.msra.mxu0 %v3747_v0  ;;  %1590 = vmatpush1.msra.mxu1 %v3753_v55 }
 0x432   : > { %1514 = vmatprep.subr.mxu0 %v3759_v52  ;;  %1591 = vmatprep.subr.mxu1 %v3765_v59 }
 0x433   : > { %1515 = vmatpush1.msra.mxu0 %v4427_v23  ;;  %1592 = vmatpush1.msra.mxu1 %v4428_v9 }
 0x434   : > { %1516 = vmatprep.subr.mxu0 %v4429_v6  ;;  %1593 = vmatprep.subr.mxu1 %v4430_v1 }
 0x435   : > { %1517 = vmatpush1.msra.mxu0 %v4431_v25  ;;  %1594 = vmatpush1.msra.mxu1 %v4432_v22  ;;  %v2346_v25 = vld [vmem:[%s2873_s27 + $0x110] sm:$0xff] }
 0x436   : > { %1518 = vmatprep.subr.mxu0 %v4433_v7  ;;  %1595 = vmatprep.subr.mxu1 %v4434_v24 }
 0x437   : > { %1519 = vmatpush1.msra.mxu0 %v4435_v26  ;;  %1596 = vmatpush1.msra.mxu1 %v4436_v20  ;;  %v2349_v26 = vld [vmem:[%s2873_s27 + $0x128] sm:$0xff] }
 0x438   : > { %1520 = vmatprep.subr.mxu0 %v4437_v5  ;;  %1597 = vmatprep.subr.mxu1 %v4438_v17 }
 0x439   : > { %1521 = vmatpush1.msra.mxu0 %v4439_v21  ;;  %1598 = vmatpush1.msra.mxu1 %v4440_v15  ;;  %v4448_v21 = vld [vmem:[#allocation30_spill] sm:$0xff] }
 0x43a   : > { %1522 = vmatprep.subr.mxu0 %v4441_v14  ;;  %1599 = vmatprep.subr.mxu1 %v4442_v16  ;;  %v4449_v14 = vld [vmem:[#allocation7_spill] sm:$0xff]  ;;  %v4450_v16 = vld [vmem:[#allocation8_spill] sm:$0xff] }
 0x43b   : > { %1523 = vmatpush1.msra.mxu0 %v4443_v18  ;;  %1600 = vmatpush1.msra.mxu1 %v4444_v11  ;;  %v2344_v18 = vld [vmem:[%s2873_s27 + $0x100] sm:$0xff]  ;;  %v2345_v11 = vld [vmem:[%s2873_s27 + $0x108] sm:$0xff] }
 0x43c   : > { %1524 = vmatprep.subr.mxu0 %v4445_v10  ;;  %1601 = vmatprep.subr.mxu1 %v4446_v27  ;;  %v2348_v27 = vld [vmem:[%s2873_s27 + $0x120] sm:$0xff] }
 0x43d   : > { %1525 = vmatpush1.msra.mxu0 %v4447_v28  ;;  %1558 = vmatprep.mubr.f32.mxu0 %v4351_v60 }
 0x43e   : > { %1602 = vmatpush1.msra.mxu1 %v4448_v21  ;;  %1635 = vmatprep.mubr.f32.mxu1 %v4351_v60 }
 0x43f   : > { %1713 = vmatprep.subr.mxu0 %v4449_v14  ;;  %1790 = vmatprep.subr.mxu1 %v4450_v16 }
 0x4dc   : > { %v1341_v15 = vpop.f32.mrf.mxu0  ;;  %v1418_v21 = vpop.f32.mrf.mxu1 }
 0x4dd   : > { %v1429_v10 = vadd.f32 %v2344_v18, %v1341_v15  ;;  %v1431_v18 = vadd.f32 %v2346_v25, %v1418_v21 }
 0x4de   : > { %v1343_v17 = vpop.f32.mrf.mxu0  ;;  %v1420_v1 = vpop.f32.mrf.mxu1 }
 0x4df   : > { %v2352_v5 = vmul.f32 -1.442695, %v1429_v10  ;;  %v1430_v20 = vadd.f32 %v2345_v11, %v1343_v17  ;;  %v2350_v17 = vld [vmem:[%s2873_s27 + $0x130] sm:$0xff]  ;;  %v2347_v10 = vld [vmem:[%s2873_s27 + $0x118] sm:$0xff]  ;;  %v2354_v6 = vmul.f32 -1.442695, %v1431_v18 }
 0x4e0   : > { %v1347_v28 = vpop.f32.mrf.mxu0  ;;  %v1424_v11 = vpop.f32.mrf.mxu1  ;;  %v1432_v23 = vadd.f32 %v2347_v10, %v1420_v1 }
 0x4e1   : > { %2570 = vpow2.f32 %v2352_v5  ;;  %v2353_v24 = vmul.f32 -1.442695, %v1430_v20  ;;  %v1433_v7 = vadd.f32 %v2348_v27, %v1347_v28  ;;  %v1435_v5 = vadd.f32 %v2350_v17, %v1424_v11  ;;  %v2351_v27 = vld [vmem:[%s2873_s27 + $0x138] sm:$0xff] }
 0x4e2   : > { %v1349_v14 = vpop.f32.mrf.mxu0  ;;  %v1426_v28 = vpop.f32.mrf.mxu1 }
 0x4e3   : > { %2572 = vpow2.f32 %v2353_v24  ;;  %v2355_v16 = vmul.f32 -1.442695, %v1433_v7  ;;  %v1434_v22 = vadd.f32 %v2349_v26, %v1349_v14  ;;  %v2357_v7 = vmul.f32 -1.442695, %v1435_v5 }
 0x4e5   : > { %2574 = vpow2.f32 %v2355_v16  ;;  %v2356_v15 = vmul.f32 -1.442695, %v1434_v22  ;;  %v1436_v22 = vadd.f32 %v2351_v27, %v1426_v28 }
 0x4e7   : > { %2576 = vpow2.f32 %v2356_v15 }
 0x4e8   : > { %2578 = vpow2.f32 %v2354_v6 }
 0x4ee   : > { %v2571_v9 = vpop.eup %2570 }
 0x4ef   : > { %v1455_v20 = vadd.f32 1.0, %v2571_v9 }
 0x4f0   : > { %v2573_v24 = vpop.eup %2572 }
 0x4f1   : > { %2580 = vrcp.f32 %v1455_v20  ;;  %v1456_v26 = vadd.f32 1.0, %v2573_v24 }
 0x4f2   : > { %v2575_v14 = vpop.eup %2574  ;;  %2582 = vtanh.f32 %v1432_v23 }
 0x4f3   : > { %2584 = vrcp.f32 %v1456_v26  ;;  %v1458_v25 = vadd.f32 1.0, %v2575_v14 }
 0x4f4   : > { %v2577_v21 = vpop.eup %2576  ;;  %2586 = vpow2.f32 %v2357_v7 }
 0x4f5   : > { %2588 = vrcp.f32 %v1458_v25  ;;  %v1459_v16 = vadd.f32 1.0, %v2577_v21  ;;  %v2579_v1 = vpop.eup %2578 }
 0x4f6   : > { %2590 = vtanh.f32 %v1436_v22  ;;  %v1457_v17 = vadd.f32 1.0, %v2579_v1  ;;  %v4452_v1 = vld [vmem:[#allocation15_spill] sm:$0xff] }
 0x4f7   : > { %2592 = vrcp.f32 %v1459_v16 }
 0x4f8   : > { %2594 = vrcp.f32 %v1457_v17  ;;  %v4456_v17 = vld [vmem:[#allocation19_spill] sm:$0xff] }
 0x4fe   : > { %v2581_v9 = vpop.eup %2580 }
 0x4ff   : > { %v2583_v15 = vpop.eup %2582 }
 0x500   : > { %v2585_v18 = vpop.eup %2584  ;;  %v1477_v10 = vmul.f32 %v2583_v15, %v2581_v9  ;;  %v4453_v9 = vld [vmem:[#allocation10_spill] sm:$0xff]  ;;  %v4454_v15 = vld [vmem:[#allocation17_spill] sm:$0xff] }
 0x501   : > { %v2587_v6 = vpop.eup %2586  ;;  %v1475_v11 = vmul.f32 %v2585_v18, %v3923_v19  ;;  %v4455_v18 = vld [vmem:[#allocation11_spill] sm:$0xff] }
 0x502   : > { %v2589_v5 = vpop.eup %2588  ;;  %v1460_v28 = vadd.f32 1.0, %v2587_v6  ;;  %v4457_v6 = vld [vmem:[#allocation12_spill] sm:$0xff] }
 0x503   : > { %v2591_v23 = vpop.eup %2590  ;;  %v4007_v20 = vadd.f32 %v1477_v10, %v1475_v11  ;;  %v4458_v11 = vld [vmem:[#allocation21_spill] sm:$0xff] }
 0x504   : > { %v2593_v27 = vpop.eup %2592  ;;  %v1478_v7 = vmul.f32 %v2591_v23, %v2589_v5  ;;  %v4459_v10 = vld [vmem:[#allocation13_spill] sm:$0xff]  ;;  %v4460_v5 = vld [vmem:[#allocation23_spill] sm:$0xff]  ;;  %v4461_v23 = vld [vmem:[#allocation14_spill] sm:$0xff] }
 0x505   : > { %2596 = vtanh.f32 %v4007_v20  ;;  %v1476_v24 = vmul.f32 %v2593_v27, %v3927_v12  ;;  %v2595_v14 = vpop.eup %2594  ;;  %v4451_v12 = vld [vmem:[#allocation9_spill] sm:$0xff] }
 0x506   : > { %2598 = vrcp.f32 %v1460_v28  ;;  %v4462_v27 = vld [vmem:[#allocation25_spill] sm:$0xff]  ;;  %v4463_v28 = vld [vmem:[#allocation16_spill] sm:$0xff] }
 0x507   : > { %v4011_v26 = vadd.f32 %v1478_v7, %v1476_v24  ;;  %v4464_v24 = vld [vmem:[#allocation26_spill] sm:$0xff] }
 0x508   : > { %v4465_v7 = vld [vmem:[#allocation18_spill] sm:$0xff] }
 0x509   : > { %2600 = vtanh.f32 %v4011_v26 }
 0x512   : > { %v2597_v19 = vpop.eup %2596 }
 0x513   : > { %v1483_v22 = vmul.f32 %v2597_v19, %v2595_v14  ;;  %v2599_v25 = vpop.eup %2598  ;;  %v4466_v14 = vld [vmem:[#allocation27_spill] sm:$0xff]  ;;  %v4467_v19 = vld [vmem:[#allocation20_spill] sm:$0xff] }
 0x515   : > { %1559 = vmatmul.mubr.f32.vlgmr.msra.gmra.mxu0 %v1483_v22  ;;  %1636 = vmatmul.mubr.f32.vlgmr.msra.gmra.mxu1 %v1483_v22  ;;  %v4468_v22 = vld [vmem:[#allocation28_spill] sm:$0xff] }
 0x516   : > { %v2601_v21 = vpop.eup %2600  ;;  %1564 = vmatprep.mubr.f32.mxu0 %v4351_v60  ;;  %1641 = vmatprep.mubr.f32.mxu1 %v4351_v60 }
 0x517   : > { %v1484_v16 = vmul.f32 %v2601_v21, %v2599_v25  ;;  %1714 = vmatpush1.msra.mxu0 %v3531_v53  ;;  %1791 = vmatpush1.msra.mxu1 %v3537_v29  ;;  %v4469_v25 = vld [vmem:[#allocation22_spill] sm:$0xff]  ;;  %v4470_v21 = vld [vmem:[#allocation29_spill] sm:$0xff] }
 0x518   : > { %1715 = vmatprep.subr.mxu0 %v3543_v30  ;;  %1792 = vmatprep.subr.mxu1 %v3549_v31 }
 0x519   : > { %1565 = vmatmul.mubr.f32.gmra.mxu0 %v1484_v16  ;;  %1642 = vmatmul.mubr.f32.gmra.mxu1 %v1484_v16  ;;  %v4471_v16 = vld [vmem:[#allocation24_spill] sm:$0xff] }
 0x51a   : > { %1716 = vmatpush1.msra.mxu0 %v3555_v32  ;;  %1793 = vmatpush1.msra.mxu1 %v3561_v33 }
 0x51b   : > { %1717 = vmatprep.subr.mxu0 %v3567_v34  ;;  %1794 = vmatprep.subr.mxu1 %v3573_v35 }
 0x51c   : > { %1718 = vmatpush1.msra.mxu0 %v3579_v36  ;;  %1795 = vmatpush1.msra.mxu1 %v3585_v37 }
 0x51d   : > { %1719 = vmatprep.subr.mxu0 %v3591_v38  ;;  %1796 = vmatprep.subr.mxu1 %v3597_v39 }
 0x51e   : > { %1720 = vmatpush1.msra.mxu0 %v3603_v40  ;;  %1797 = vmatpush1.msra.mxu1 %v3609_v41 }
 0x51f   : > { %1721 = vmatprep.subr.mxu0 %v3615_v43  ;;  %1798 = vmatprep.subr.mxu1 %v3621_v45 }
 0x520   : > { %1722 = vmatpush1.msra.mxu0 %v3627_v47  ;;  %1799 = vmatpush1.msra.mxu1 %v3633_v49 }
 0x521   : > { %1723 = vmatprep.subr.mxu0 %v3639_v51  ;;  %1800 = vmatprep.subr.mxu1 %v3645_v13 }
 0x522   : > { %1724 = vmatpush1.msra.mxu0 %v3651_v58  ;;  %1801 = vmatpush1.msra.mxu1 %v3657_v2 }
 0x523   : > { %1725 = vmatprep.subr.mxu0 %v3663_v61  ;;  %1802 = vmatprep.subr.mxu1 %v3669_v48 }
 0x524   : > { %1726 = vmatpush1.msra.mxu0 %v3675_v8  ;;  %1803 = vmatpush1.msra.mxu1 %v3681_v46 }
 0x525   : > { %1727 = vmatprep.subr.mxu0 %v3687_v50  ;;  %1804 = vmatprep.subr.mxu1 %v3693_v57 }
 0x526   : > { %1728 = vmatpush1.msra.mxu0 %v3699_v54  ;;  %1805 = vmatpush1.msra.mxu1 %v3705_v42 }
 0x527   : > { %1729 = vmatprep.subr.mxu0 %v3711_v62  ;;  %1806 = vmatprep.subr.mxu1 %v3717_v63 }
 0x528   : > { %1730 = vmatpush1.msra.mxu0 %v3723_v3  ;;  %1807 = vmatpush1.msra.mxu1 %v3729_v56 }
 0x529   : > { %1731 = vmatprep.subr.mxu0 %v3735_v4  ;;  %1808 = vmatprep.subr.mxu1 %v3741_v44 }
 0x52a   : > { %1732 = vmatpush1.msra.mxu0 %v3747_v0  ;;  %1809 = vmatpush1.msra.mxu1 %v3753_v55 }
 0x52b   : > { %1733 = vmatprep.subr.mxu0 %v3759_v52  ;;  %1810 = vmatprep.subr.mxu1 %v3765_v59 }
 0x52c   : > { %1734 = vmatpush1.msra.mxu0 %v4451_v12  ;;  %1811 = vmatpush1.msra.mxu1 %v4452_v1 }
 0x52d   : > { %1735 = vmatprep.subr.mxu0 %v4453_v9  ;;  %1812 = vmatprep.subr.mxu1 %v4454_v15 }
 0x52e   : > { %1736 = vmatpush1.msra.mxu0 %v4455_v18  ;;  %1813 = vmatpush1.msra.mxu1 %v4456_v17  ;;  %v2360_v18 = vld [vmem:[%s2873_s27 + $0x150] sm:$0xff] }
 0x52f   : > { %1737 = vmatprep.subr.mxu0 %v4457_v6  ;;  %1814 = vmatprep.subr.mxu1 %v4458_v11 }
 0x530   : > { %1738 = vmatpush1.msra.mxu0 %v4459_v10  ;;  %1815 = vmatpush1.msra.mxu1 %v4460_v5  ;;  %v2363_v10 = vld [vmem:[%s2873_s27 + $0x168] sm:$0xff] }
 0x531   : > { %1739 = vmatprep.subr.mxu0 %v4461_v23  ;;  %1816 = vmatprep.subr.mxu1 %v4462_v27 }
 0x532   : > { %1740 = vmatpush1.msra.mxu0 %v4463_v28  ;;  %1817 = vmatpush1.msra.mxu1 %v4464_v24  ;;  %v4472_v28 = vld [vmem:[#allocation30_spill] sm:$0xff] }
 0x533   : > { %1741 = vmatprep.subr.mxu0 %v4465_v7  ;;  %1818 = vmatprep.subr.mxu1 %v4466_v14  ;;  %v4473_v7 = vld [vmem:[#allocation7_spill] sm:$0xff]  ;;  %v4474_v14 = vld [vmem:[#allocation8_spill] sm:$0xff] }
 0x534   : > { %1742 = vmatpush1.msra.mxu0 %v4467_v19  ;;  %1819 = vmatpush1.msra.mxu1 %v4468_v22  ;;  %v2358_v19 = vld [vmem:[%s2873_s27 + $0x140] sm:$0xff]  ;;  %v2359_v22 = vld [vmem:[%s2873_s27 + $0x148] sm:$0xff] }
 0x535   : > { %1743 = vmatprep.subr.mxu0 %v4469_v25  ;;  %1820 = vmatprep.subr.mxu1 %v4470_v21  ;;  %v2362_v21 = vld [vmem:[%s2873_s27 + $0x160] sm:$0xff] }
 0x536   : > { %1744 = vmatpush1.msra.mxu0 %v4471_v16  ;;  %1777 = vmatprep.mubr.f32.mxu0 %v4351_v60 }
 0x537   : > { %1821 = vmatpush1.msra.mxu1 %v4472_v28  ;;  %1854 = vmatprep.mubr.f32.mxu1 %v4351_v60 }
 0x538   : > { %1932 = vmatprep.subr.mxu0 %v4473_v7  ;;  %2009 = vmatprep.subr.mxu1 %v4474_v14 }
 0x5d5   : > { %v1560_v24 = vpop.f32.mrf.mxu0  ;;  %v1637_v28 = vpop.f32.mrf.mxu1 }
 0x5d6   : > { %v1648_v25 = vadd.f32 %v2358_v19, %v1560_v24  ;;  %v1650_v19 = vadd.f32 %v2360_v18, %v1637_v28 }
 0x5d7   : > { %v1562_v27 = vpop.f32.mrf.mxu0  ;;  %v1639_v15 = vpop.f32.mrf.mxu1 }
 0x5d8   : > { %v2366_v23 = vmul.f32 -1.442695, %v1648_v25  ;;  %v1649_v5 = vadd.f32 %v2359_v22, %v1562_v27  ;;  %v2364_v27 = vld [vmem:[%s2873_s27 + $0x170] sm:$0xff]  ;;  %v2361_v25 = vld [vmem:[%s2873_s27 + $0x158] sm:$0xff]  ;;  %v2368_v9 = vmul.f32 -1.442695, %v1650_v19 }
 0x5d9   : > { %v1566_v16 = vpop.f32.mrf.mxu0  ;;  %v1643_v22 = vpop.f32.mrf.mxu1  ;;  %v1651_v12 = vadd.f32 %v2361_v25, %v1639_v15 }
 0x5da   : > { %2602 = vpow2.f32 %v2366_v23  ;;  %v2367_v11 = vmul.f32 -1.442695, %v1649_v5  ;;  %v1652_v6 = vadd.f32 %v2362_v21, %v1566_v16  ;;  %v1654_v23 = vadd.f32 %v2364_v27, %v1643_v22  ;;  %v2365_v21 = vld [vmem:[%s2873_s27 + $0x178] sm:$0xff] }
 0x5db   : > { %v1568_v7 = vpop.f32.mrf.mxu0  ;;  %v1645_v16 = vpop.f32.mrf.mxu1 }
 0x5dc   : > { %2604 = vpow2.f32 %v2367_v11  ;;  %v2369_v14 = vmul.f32 -1.442695, %v1652_v6  ;;  %v1653_v17 = vadd.f32 %v2363_v10, %v1568_v7  ;;  %v2371_v6 = vmul.f32 -1.442695, %v1654_v23 }
 0x5de   : > { %2606 = vpow2.f32 %v2369_v14  ;;  %v2370_v24 = vmul.f32 -1.442695, %v1653_v17  ;;  %v1655_v17 = vadd.f32 %v2365_v21, %v1645_v16 }
 0x5e0   : > { %2608 = vpow2.f32 %v2370_v24 }
 0x5e1   : > { %2610 = vpow2.f32 %v2368_v9 }
 0x5e7   : > { %v2603_v1 = vpop.eup %2602 }
 0x5e8   : > { %v1674_v5 = vadd.f32 1.0, %v2603_v1 }
 0x5e9   : > { %v2605_v11 = vpop.eup %2604 }
 0x5ea   : > { %2612 = vrcp.f32 %v1674_v5  ;;  %v1675_v10 = vadd.f32 1.0, %v2605_v11 }
 0x5eb   : > { %v2607_v7 = vpop.eup %2606  ;;  %2614 = vtanh.f32 %v1651_v12 }
 0x5ec   : > { %2616 = vrcp.f32 %v1675_v10  ;;  %v1677_v18 = vadd.f32 1.0, %v2607_v7 }
 0x5ed   : > { %v2609_v28 = vpop.eup %2608  ;;  %2618 = vpow2.f32 %v2371_v6 }
 0x5ee   : > { %2620 = vrcp.f32 %v1677_v18  ;;  %v1678_v14 = vadd.f32 1.0, %v2609_v28  ;;  %v2611_v15 = vpop.eup %2610 }
 0x5ef   : > { %2622 = vtanh.f32 %v1655_v17  ;;  %v1676_v27 = vadd.f32 1.0, %v2611_v15 }
 0x5f0   : > { %2624 = vrcp.f32 %v1678_v14 }
 0x5f1   : > { %2626 = vrcp.f32 %v1676_v27 }
 0x5f7   : > { %v2613_v1 = vpop.eup %2612 }
 0x5f8   : > { %v2615_v24 = vpop.eup %2614 }
 0x5f9   : > { %v2617_v19 = vpop.eup %2616  ;;  %v1696_v25 = vmul.f32 %v2615_v24, %v2613_v1  ;;  %v2378_v1 = vld [vmem:[%s2873_s27 + $0x1b0] sm:$0xff] }
 0x5fa   : > { %v2619_v9 = vpop.eup %2618  ;;  %v1694_v22 = vmul.f32 %v2617_v19, %v4007_v20  ;;  %v2375_v19 = vld [vmem:[%s2873_s27 + $0x198] sm:$0xff] }
 0x5fb   : > { %v2621_v23 = vpop.eup %2620  ;;  %v1679_v16 = vadd.f32 1.0, %v2619_v9 }
 0x5fc   : > { %v2623_v12 = vpop.eup %2622  ;;  %v4091_v5 = vadd.f32 %v1696_v25, %v1694_v22 }
 0x5fd   : > { %v2625_v21 = vpop.eup %2624  ;;  %v1697_v6 = vmul.f32 %v2623_v12, %v2621_v23  ;;  %v2379_v12 = vld [vmem:[%s2873_s27 + $0x1b8] sm:$0xff] }
 0x5fe   : > { %2628 = vtanh.f32 %v4091_v5  ;;  %v1695_v11 = vmul.f32 %v2625_v21, %v4011_v26  ;;  %v2627_v7 = vpop.eup %2626 }
 0x5ff   : > { %2630 = vrcp.f32 %v1679_v16 }
 0x600   : > { %v4095_v10 = vadd.f32 %v1697_v6, %v1695_v11 }
 0x602   : > { %2632 = vtanh.f32 %v4095_v10 }
 0x60b   : > { %v2629_v20 = vpop.eup %2628 }
 0x60c   : > { %v1702_v17 = vmul.f32 %v2629_v20, %v2627_v7  ;;  %v2631_v18 = vpop.eup %2630 }
 0x60e   : > { %1778 = vmatmul.mubr.f32.vlgmr.msra.gmra.mxu0 %v1702_v17  ;;  %1855 = vmatmul.mubr.f32.vlgmr.msra.gmra.mxu1 %v1702_v17 }
 0x60f   : > { %v2633_v28 = vpop.eup %2632  ;;  %1783 = vmatprep.mubr.f32.mxu0 %v4351_v60  ;;  %1860 = vmatprep.mubr.f32.mxu1 %v4351_v60 }
 0x610   : > { %v1703_v14 = vmul.f32 %v2633_v28, %v2631_v18  ;;  %1933 = vmatpush1.msra.mxu0 %v3531_v53  ;;  %2010 = vmatpush1.msra.mxu1 %v3537_v29  ;;  %v4475_v53 = vld [vmem:[#allocation9_spill] sm:$0xff]  ;;  %v4476_v29 = vld [vmem:[#allocation15_spill] sm:$0xff] }
 0x611   : > { %1934 = vmatprep.subr.mxu0 %v3543_v30  ;;  %2011 = vmatprep.subr.mxu1 %v3549_v31  ;;  %v4477_v30 = vld [vmem:[#allocation10_spill] sm:$0xff]  ;;  %v4478_v31 = vld [vmem:[#allocation17_spill] sm:$0xff] }
 0x612   : > { %1784 = vmatmul.mubr.f32.gmra.mxu0 %v1703_v14  ;;  %1861 = vmatmul.mubr.f32.gmra.mxu1 %v1703_v14 }
 0x613   : > { %1935 = vmatpush1.msra.mxu0 %v3555_v32  ;;  %2012 = vmatpush1.msra.mxu1 %v3561_v33  ;;  %v4479_v32 = vld [vmem:[#allocation11_spill] sm:$0xff] }
 0x614   : > { %1936 = vmatprep.subr.mxu0 %v3567_v34  ;;  %2013 = vmatprep.subr.mxu1 %v3573_v35  ;;  %v4480_v33 = vld [vmem:[#allocation19_spill] sm:$0xff]  ;;  %v4481_v34 = vld [vmem:[#allocation12_spill] sm:$0xff]  ;;  %v4482_v35 = vld [vmem:[#allocation21_spill] sm:$0xff] }
 0x615   : > { %1937 = vmatpush1.msra.mxu0 %v3579_v36  ;;  %2014 = vmatpush1.msra.mxu1 %v3585_v37  ;;  %v4483_v36 = vld [vmem:[#allocation13_spill] sm:$0xff]  ;;  %v4484_v37 = vld [vmem:[#allocation23_spill] sm:$0xff] }
 0x616   : > { %1938 = vmatprep.subr.mxu0 %v3591_v38  ;;  %2015 = vmatprep.subr.mxu1 %v3597_v39  ;;  %v4485_v38 = vld [vmem:[#allocation14_spill] sm:$0xff]  ;;  %v4486_v39 = vld [vmem:[#allocation25_spill] sm:$0xff] }
 0x617   : > { %1939 = vmatpush1.msra.mxu0 %v3603_v40  ;;  %2016 = vmatpush1.msra.mxu1 %v3609_v41  ;;  %v4487_v40 = vld [vmem:[#allocation16_spill] sm:$0xff]  ;;  %v4488_v41 = vld [vmem:[#allocation26_spill] sm:$0xff] }
 0x618   : > { %1940 = vmatprep.subr.mxu0 %v3615_v43  ;;  %2017 = vmatprep.subr.mxu1 %v3621_v45  ;;  %v4489_v43 = vld [vmem:[#allocation18_spill] sm:$0xff]  ;;  %v4490_v45 = vld [vmem:[#allocation27_spill] sm:$0xff] }
 0x619   : > { %1941 = vmatpush1.msra.mxu0 %v3627_v47  ;;  %2018 = vmatpush1.msra.mxu1 %v3633_v49  ;;  %v4491_v47 = vld [vmem:[#allocation20_spill] sm:$0xff] }
 0x61a   : > { %1942 = vmatprep.subr.mxu0 %v3639_v51  ;;  %2019 = vmatprep.subr.mxu1 %v3645_v13  ;;  %v4492_v49 = vld [vmem:[#allocation28_spill] sm:$0xff]  ;;  %v4493_v51 = vld [vmem:[#allocation22_spill] sm:$0xff]  ;;  %v4494_v13 = vld [vmem:[#allocation29_spill] sm:$0xff] }
 0x61b   : > { %1943 = vmatpush1.msra.mxu0 %v3651_v58  ;;  %2020 = vmatpush1.msra.mxu1 %v3657_v2  ;;  %v4495_v58 = vld [vmem:[#allocation24_spill] sm:$0xff]  ;;  %v4496_v2 = vld [vmem:[#allocation30_spill] sm:$0xff] }
 0x61c   : > { %1944 = vmatprep.subr.mxu0 %v3663_v61  ;;  %2021 = vmatprep.subr.mxu1 %v3669_v48  ;;  %v2372_v61 = vld [vmem:[%s2873_s27 + $0x180] sm:$0xff] }
 0x61d   : > { %1945 = vmatpush1.msra.mxu0 %v3675_v8  ;;  %2022 = vmatpush1.msra.mxu1 %v3681_v46  ;;  %v2373_v8 = vld [vmem:[%s2873_s27 + $0x188] sm:$0xff] }
 0x61e   : > { %1946 = vmatprep.subr.mxu0 %v3687_v50  ;;  %2023 = vmatprep.subr.mxu1 %v3693_v57  ;;  %v2376_v57 = vld [vmem:[%s2873_s27 + $0x1a0] sm:$0xff] }
 0x61f   : > { %1947 = vmatpush1.msra.mxu0 %v3699_v54  ;;  %2024 = vmatpush1.msra.mxu1 %v3705_v42 }
 0x620   : > { %1948 = vmatprep.subr.mxu0 %v3711_v62  ;;  %2025 = vmatprep.subr.mxu1 %v3717_v63  ;;  %v2377_v63 = vld [vmem:[%s2873_s27 + $0x1a8] sm:$0xff] }
 0x621   : > { %1949 = vmatpush1.msra.mxu0 %v3723_v3  ;;  %2026 = vmatpush1.msra.mxu1 %v3729_v56 }
 0x622   : > { %1950 = vmatprep.subr.mxu0 %v3735_v4  ;;  %2027 = vmatprep.subr.mxu1 %v3741_v44 }
 0x623   : > { %1951 = vmatpush1.msra.mxu0 %v3747_v0  ;;  %2028 = vmatpush1.msra.mxu1 %v3753_v55 }
 0x624   : > { %1952 = vmatprep.subr.mxu0 %v3759_v52  ;;  %2029 = vmatprep.subr.mxu1 %v3765_v59  ;;  %v2374_v52 = vld [vmem:[%s2873_s27 + $0x190] sm:$0xff] }
 0x625   : > { %1953 = vmatpush1.msra.mxu0 %v4475_v53  ;;  %2030 = vmatpush1.msra.mxu1 %v4476_v29 }
 0x626   : > { %1954 = vmatprep.subr.mxu0 %v4477_v30  ;;  %2031 = vmatprep.subr.mxu1 %v4478_v31 }
 0x627   : > { %1955 = vmatpush1.msra.mxu0 %v4479_v32  ;;  %2032 = vmatpush1.msra.mxu1 %v4480_v33 }
 0x628   : > { %1956 = vmatprep.subr.mxu0 %v4481_v34  ;;  %2033 = vmatprep.subr.mxu1 %v4482_v35 }
 0x629   : > { %1957 = vmatpush1.msra.mxu0 %v4483_v36  ;;  %2034 = vmatpush1.msra.mxu1 %v4484_v37 }
 0x62a   : > { %1958 = vmatprep.subr.mxu0 %v4485_v38  ;;  %2035 = vmatprep.subr.mxu1 %v4486_v39 }
 0x62b   : > { %1959 = vmatpush1.msra.mxu0 %v4487_v40  ;;  %2036 = vmatpush1.msra.mxu1 %v4488_v41 }
 0x62c   : > { %1960 = vmatprep.subr.mxu0 %v4489_v43  ;;  %2037 = vmatprep.subr.mxu1 %v4490_v45 }
 0x62d   : > { %1961 = vmatpush1.msra.mxu0 %v4491_v47  ;;  %2038 = vmatpush1.msra.mxu1 %v4492_v49 }
 0x62e   : > { %1962 = vmatprep.subr.mxu0 %v4493_v51  ;;  %2039 = vmatprep.subr.mxu1 %v4494_v13  ;;  %v2386_v13 = vld [vmem:[%s2873_s27 + $0x1c0] sm:$0xff] }
 0x62f   : > { %1963 = vmatpush1.msra.mxu0 %v4495_v58  ;;  %1996 = vmatprep.mubr.f32.mxu0 %v4351_v60 }
 0x630   : > { %2040 = vmatpush1.msra.mxu1 %v4496_v2  ;;  %2073 = vmatprep.mubr.f32.mxu1 %v4351_v60  ;;  %v2387_v2 = vld [vmem:[%s2873_s27 + $0x1c8] sm:$0xff] }
 0x6ce   : > { %v1779_v48 = vpop.f32.mrf.mxu0  ;;  %v1856_v3 = vpop.f32.mrf.mxu1 }
 0x6cf   : > { %v1867_v46 = vadd.f32 %v2372_v61, %v1779_v48  ;;  %v1869_v15 = vadd.f32 %v2374_v52, %v1856_v3  ;;  %v2392_v52 = vld [vmem:[%s2873_s27 + $0x1f0] sm:$0xff] }
 0x6d0   : > { %v1781_v50 = vpop.f32.mrf.mxu0  ;;  %v1858_v59 = vpop.f32.mrf.mxu1 }
 0x6d1   : > { %v2380_v54 = vmul.f32 -1.442695, %v1867_v46  ;;  %v1868_v42 = vadd.f32 %v2373_v8, %v1781_v50  ;;  %v2382_v27 = vmul.f32 -1.442695, %v1869_v15  ;;  %v1870_v25 = vadd.f32 %v2375_v19, %v1858_v59  ;;  %v2390_v8 = vld [vmem:[%s2873_s27 + $0x1e0] sm:$0xff] }
 0x6d2   : > { %v1785_v62 = vpop.f32.mrf.mxu0  ;;  %v1862_v24 = vpop.f32.mrf.mxu1 }
 0x6d3   : > { %2634 = vpow2.f32 %v2380_v54  ;;  %v2381_v56 = vmul.f32 -1.442695, %v1868_v42  ;;  %v1871_v4 = vadd.f32 %v2376_v57, %v1785_v62  ;;  %v1873_v9 = vadd.f32 %v2378_v1, %v1862_v24  ;;  %v2391_v54 = vld [vmem:[%s2873_s27 + $0x1e8] sm:$0xff] }
 0x6d4   : > { %v1787_v44 = vpop.f32.mrf.mxu0  ;;  %v1864_v21 = vpop.f32.mrf.mxu1 }
 0x6d5   : > { %2636 = vpow2.f32 %v2381_v56  ;;  %v2383_v0 = vmul.f32 -1.442695, %v1871_v4  ;;  %v1872_v55 = vadd.f32 %v2377_v63, %v1787_v44  ;;  %v2385_v11 = vmul.f32 -1.442695, %v1873_v9  ;;  %v2388_v4 = vld [vmem:[%s2873_s27 + $0x1d0] sm:$0xff]  ;;  %v2393_v9 = vld [vmem:[%s2873_s27 + $0x1f8] sm:$0xff] }
 0x6d6   : > { %v1874_v20 = vadd.f32 %v2379_v12, %v1864_v21 }
 0x6d7   : > { %2638 = vpow2.f32 %v2383_v0  ;;  %v2384_v26 = vmul.f32 -1.442695, %v1872_v55 }
 0x6d9   : > { %2640 = vpow2.f32 %v2384_v26  ;;  %v2389_v26 = vld [vmem:[%s2873_s27 + $0x1d8] sm:$0xff] }
 0x6da   : > { %2642 = vpow2.f32 %v2382_v27 }
 0x6e0   : > { %v2635_v22 = vpop.eup %2634 }
 0x6e1   : > { %v1893_v23 = vadd.f32 1.0, %v2635_v22 }
 0x6e2   : > { %v2637_v16 = vpop.eup %2636 }
 0x6e3   : > { %2644 = vrcp.f32 %v1893_v23  ;;  %v1894_v6 = vadd.f32 1.0, %v2637_v16 }
 0x6e4   : > { %v2639_v7 = vpop.eup %2638  ;;  %2646 = vtanh.f32 %v1870_v25 }
 0x6e5   : > { %2648 = vrcp.f32 %v1894_v6  ;;  %v1896_v17 = vadd.f32 1.0, %v2639_v7 }
 0x6e6   : > { %v2641_v18 = vpop.eup %2640  ;;  %2650 = vpow2.f32 %v2385_v11 }
 0x6e7   : > { %2652 = vrcp.f32 %v1896_v17  ;;  %v1897_v28 = vadd.f32 1.0, %v2641_v18  ;;  %v2643_v14 = vpop.eup %2642 }
 0x6e8   : > { %2654 = vtanh.f32 %v1874_v20  ;;  %v1895_v31 = vadd.f32 1.0, %v2643_v14 }
 0x6e9   : > { %2656 = vrcp.f32 %v1897_v28 }
 0x6ea   : > { %2658 = vrcp.f32 %v1895_v31 }
 0x6f0   : > { %v2645_v53 = vpop.eup %2644 }
 0x6f1   : > { %v2647_v29 = vpop.eup %2646 }
 0x6f2   : > { %v2649_v30 = vpop.eup %2648  ;;  %v1915_v34 = vmul.f32 %v2647_v29, %v2645_v53 }
 0x6f3   : > { %v2651_v32 = vpop.eup %2650  ;;  %v1913_v33 = vmul.f32 %v2649_v30, %v4091_v5 }
 0x6f4   : > { %v2653_v35 = vpop.eup %2652  ;;  %v1898_v39 = vadd.f32 1.0, %v2651_v32 }
 0x6f5   : > { %v2655_v36 = vpop.eup %2654  ;;  %v4173_v37 = vadd.f32 %v1915_v34, %v1913_v33 }
 0x6f6   : > { %v2657_v38 = vpop.eup %2656  ;;  %v1916_v41 = vmul.f32 %v2655_v36, %v2653_v35 }
 0x6f7   : > { %2660 = vtanh.f32 %v4173_v37  ;;  %v1914_v40 = vmul.f32 %v2657_v38, %v4095_v10  ;;  %v2659_v5 = vpop.eup %2658 }
 0x6f8   : > { %2662 = vrcp.f32 %v1898_v39 }
 0x6f9   : > { %v4177_v43 = vadd.f32 %v1916_v41, %v1914_v40 }
 0x6fb   : > { %2664 = vtanh.f32 %v4177_v43 }
 0x704   : > { %v2661_v45 = vpop.eup %2660 }
 0x705   : > { %v1921_v47 = vmul.f32 %v2661_v45, %v2659_v5  ;;  %v2663_v49 = vpop.eup %2662 }
 0x707   : > { %1997 = vmatmul.mubr.f32.vlgmr.msra.gmra.mxu0 %v1921_v47  ;;  %2074 = vmatmul.mubr.f32.vlgmr.msra.gmra.mxu1 %v1921_v47 }
 0x708   : > { %v2665_v51 = vpop.eup %2664  ;;  %2002 = vmatprep.mubr.f32.mxu0 %v4351_v60  ;;  %2079 = vmatprep.mubr.f32.mxu1 %v4351_v60 }
 0x709   : > { %v1922_v10 = vmul.f32 %v2665_v51, %v2663_v49 }
 0x70b   : > { %2003 = vmatmul.mubr.f32.gmra.mxu0 %v1922_v10  ;;  %2080 = vmatmul.mubr.f32.gmra.mxu1 %v1922_v10 }
 0x7c7   : > { %v1998_v58 = vpop.f32.mrf.mxu0  ;;  %v2075_v42 = vpop.f32.mrf.mxu1 }
 0x7c8   : > { %v2086_v61 = vadd.f32 %v2386_v13, %v1998_v58  ;;  %v2088_v55 = vadd.f32 %v2388_v4, %v2075_v42 }
 0x7c9   : > { %v2000_v48 = vpop.f32.mrf.mxu0  ;;  %v2077_v44 = vpop.f32.mrf.mxu1 }
 0x7ca   : > { %v2394_v46 = vmul.f32 -1.442695, %v2086_v61  ;;  %v2087_v50 = vadd.f32 %v2387_v2, %v2000_v48  ;;  %v2396_v15 = vmul.f32 -1.442695, %v2088_v55  ;;  %v2089_v19 = vadd.f32 %v2389_v26, %v2077_v44 }
 0x7cb   : > { %v2004_v57 = vpop.f32.mrf.mxu0  ;;  %v2081_v59 = vpop.f32.mrf.mxu1 }
 0x7cc   : > { %2666 = vpow2.f32 %v2394_v46  ;;  %v2395_v62 = vmul.f32 -1.442695, %v2087_v50  ;;  %v2090_v60 = vadd.f32 %v2390_v8, %v2004_v57  ;;  %v2092_v1 = vadd.f32 %v2392_v52, %v2081_v59 }
 0x7cd   : > { %v2006_v63 = vpop.f32.mrf.mxu0  ;;  %v2083_v22 = vpop.f32.mrf.mxu1 }
 0x7ce   : > { %2668 = vpow2.f32 %v2395_v62  ;;  %v2397_v3 = vmul.f32 -1.442695, %v2090_v60  ;;  %v2091_v56 = vadd.f32 %v2391_v54, %v2006_v63  ;;  %v2399_v23 = vmul.f32 -1.442695, %v2092_v1 }
 0x7cf   : > { %v2093_v16 = vadd.f32 %v2393_v9, %v2083_v22 }
 0x7d0   : > { %2670 = vpow2.f32 %v2397_v3  ;;  %v2398_v0 = vmul.f32 -1.442695, %v2091_v56 }
 0x7d2   : > { %2672 = vpow2.f32 %v2398_v0 }
 0x7d3   : > { %2674 = vpow2.f32 %v2396_v15 }
 0x7d9   : > { %v2667_v24 = vpop.eup %2666 }
 0x7da   : > { %v2112_v27 = vadd.f32 1.0, %v2667_v24 }
 0x7db   : > { %v2669_v25 = vpop.eup %2668 }
 0x7dc   : > { %2676 = vrcp.f32 %v2112_v27  ;;  %v2113_v12 = vadd.f32 1.0, %v2669_v25 }
 0x7dd   : > { %v2671_v21 = vpop.eup %2670  ;;  %2678 = vtanh.f32 %v2089_v19 }
 0x7de   : > { %2680 = vrcp.f32 %v2113_v12  ;;  %v2115_v11 = vadd.f32 1.0, %v2671_v21 }
 0x7df   : > { %v2673_v6 = vpop.eup %2672  ;;  %2682 = vpow2.f32 %v2399_v23 }
 0x7e0   : > { %2684 = vrcp.f32 %v2115_v11  ;;  %v2116_v7 = vadd.f32 1.0, %v2673_v6  ;;  %v2675_v20 = vpop.eup %2674 }
 0x7e1   : > { %2686 = vtanh.f32 %v2093_v16  ;;  %v2114_v14 = vadd.f32 1.0, %v2675_v20 }
 0x7e2   : > { %2688 = vrcp.f32 %v2116_v7 }
 0x7e3   : > { %2690 = vrcp.f32 %v2114_v14 }
 0x7e9   : > { %v2677_v17 = vpop.eup %2676 }
 0x7ea   : > { %v2679_v18 = vpop.eup %2678 }
 0x7eb   : > { %v2681_v28 = vpop.eup %2680  ;;  %v2134_v30 = vmul.f32 %v2679_v18, %v2677_v17 }
 0x7ec   : > { %v2683_v53 = vpop.eup %2682  ;;  %v2132_v29 = vmul.f32 %v2681_v28, %v4173_v37 }
 0x7ed   : > { %v2685_v31 = vpop.eup %2684  ;;  %v2117_v35 = vadd.f32 1.0, %v2683_v53 }
 0x7ee   : > { %v2687_v32 = vpop.eup %2686  ;;  %v2136_v33 = vadd.f32 %v2134_v30, %v2132_v29 }
 0x7ef   : > { %v2689_v34 = vpop.eup %2688  ;;  %v2135_v38 = vmul.f32 %v2687_v32, %v2685_v31 }
 0x7f0   : > { %2692 = vtanh.f32 %v2136_v33  ;;  %2144 = vst [vmem:[#allocation3 + $0x8] sm:$0xff] %v2136_v33  ;;  %v2133_v36 = vmul.f32 %v2689_v34, %v4177_v43  ;;  %v2691_v40 = vpop.eup %2690 }
 0x7f1   : > { %2694 = vrcp.f32 %v2117_v35 }
 0x7f2   : > { %v2137_v39 = vadd.f32 %v2135_v38, %v2133_v36 }
 0x7f4   : > { %2696 = vtanh.f32 %v2137_v39  ;;  %2145 = vst [vmem:[#allocation3] sm:$0xff] %v2137_v39 }
 0x7fd   : > { %v2693_v41 = vpop.eup %2692 }
 0x7fe   : > { %v2140_v5 = vmul.f32 %v2693_v41, %v2691_v40  ;;  %v2695_v37 = vpop.eup %2694 }
 0x800   : > { %2142 = vst [vmem:[#allocation2] sm:$0xff] %v2140_v5  ;;  %2149 = sbr.rel (%p2400_p6) target bundleno = 2055 (0x807), region = 44 }
 0x801   : > { %v2697_v45 = vpop.eup %2696 }
 0x802   : > { %v2141_v47 = vmul.f32 %v2697_v45, %v2695_v37 }
 0x804   : > { %2143 = vst [vmem:[#allocation2 + $0x8] sm:$0xff] %v2141_v47 }
 0x805   : > { %2150 = vst [vmem:[%s4229_s4] sm:$0xff] %v2140_v5  ;;  %2151 = vst [vmem:[%s4229_s4 + $0x8] sm:$0xff] %v2141_v47 }
 0x806   : > { %2152 = vst [vmem:[#allocation4] sm:$0xff] %v2136_v33  ;;  %2153 = vst [vmem:[#allocation4 + $0x8] sm:$0xff] %v2137_v39 }
 0x807 PF: > { %p4201_p7 = scmp.eq.s32.totalorder %s2286_s21, 1  ;;  %s2815_s18 = smov [#allocation4]  }
 0x808   : > { %s2172_s30 = sshll.u32 %s2815_s18, 4  ;;  %s2173_s30 = int_to_ptr.vmem [resolvable:$true] %s2172_s30 }
 0x809   : > { %s2762_s6 = scalar_lea.vmem %s2173_s30, 256  ;;  %p2769_p11 = scmp.lt.s32.totalorder %s2173_s30, %s2173_s30 }
 0x80a   : > { %p2763_p8 = scmp.ne.s32.totalorder %s2173_s30, %s2762_s6  ;;  %p2770_p12 = scmp.lt.s32.totalorder %s2762_s6, %s2762_s6 }
 0x80c   : > { %p2764_p9 = pnand %p2763_p8, %p4201_p7  ;;  %p2771_p13 = por %p2770_p12, %p2769_p11 }
 0x80e   : > { %p2765_p10 = pneg %p2764_p9 }
 0x810   : > { %p2772_p0 = pnand %p2771_p13, %p2765_p10 }
 0x812   : > { %2775 = shalt.err (!%p2772_p0)
}
 0x813   : > { %s2816_s7 = smov 128   ;;  %s2817_s21 = smov 8  }
 0x814   : > { %2409 = dma.vmem_to_hbm [thread:$0]  (%p4201_p7), %s2173_s30, 256, %s4230_s5, [#allocation5], %s2816_s7, %s2816_s7, %s2817_s21  }
 0x815   : > { %2799 = dma.done.wait (%p4201_p7), [#allocation5], 256  }
 0x816   : > { %2801 = vsyncadd (%p4201_p7), [#allocation5], 4294967040 }
 0x817 PF: > { %s17_s20 = sadd.s32 1, %s2812_s20   ;;  %s4498_s18 = smov %s2808_s19 }
 0x818   : > { %p14_p1 = scmp.ge.s32.totalorder %s17_s20, 4   ;;  %s4499_s19 = smov %s4501_s22 }
 0x81a   :  { %16 = sbr.rel (!%p14_p1) target bundleno = 2 (0x2), region = 97 }
 0x81f   :  { %2196 = vsyncpa [#allocation5], 1 }
 0x820   :  { %2198 = vsyncpa [#allocation5 + $0x1], 1 }

</bundles_post_ra>
